<compile_context>
chip_gen: v6e
topology: v6e:2x2x1
jax: 0.10.0
libtpu: 0.0.40
codegen_flags: <defaults>
</compile_context>

<pallas_src>
import jax
import jax.numpy as jnp
from jax.experimental import pallas as pl
from jax.experimental.pallas import tpu as pltpu

INPUT_SIZE = 73
HIDDEN_SIZE = 4
OUTPUT_SIZE = 1
NUM_LAYERS = 2   # hard-wired as two explicit layers below (matches the module)
B_PAD = 8        # batch padded to one f32 sublane group


def _make_lstm_kernel(S, B, H):
    # B is the padded batch (one sublane group).
    G = 4 * H
    H3 = 3 * H

    def small_matmul(h, w_rows):
        # (B, H) @ (H, G) with H == 4: keep it off the MXU (and its result
        # FIFO) — VPU broadcast multiply-adds against PRE-BROADCAST weight
        # rows (hoisted out of the time loop by the caller).
        acc = h[:, 0:1] * w_rows[0]
        for k in range(1, H):
            acc = acc + h[:, k:k + 1] * w_rows[k]
        return acc

    def activate(pre, c_prev):
        # Single-tanh activation: the 0.5 pre-scale of the f/o/i columns was
        # folded into the packed weights/biases, so sigmoid(z) = 0.5*tanh+0.5
        # for those columns and the g column is a plain tanh.  Gate order
        # along lanes is (f, o, i, g).
        t = jnp.tanh(pre)                         # (B, 4H): 1 EUP push
        s = 0.5 * t[:, :H3] + 0.5                 # f, o, i (VPU affine)
        f = s[:, 0:H]
        o = s[:, H:2 * H]
        i = s[:, 2 * H:H3]
        g = t[:, H3:]
        c = i * g if c_prev is None else f * c_prev + i * g
        h = o * jnp.tanh(c)                       # 2nd (and last) EUP push
        return h, c

    def kernel(x_ref, wih0_ref, p_ref, out_ref):
        # x_ref:    (S*B, I)   time-major, batch padded to B
        # wih0_ref: (I, 4H)    layer-0 input weights, columns (f, o, i, g)
        # p_ref:    (4H, 4H)   all small params packed:
        #   rows 0:H whh0 | H:2H wih1 | 2H:3H whh1 | 3H b0 | 3H+1 b1 |
        #   3H+2 wfc (lanes 0:H) | 3H+3 bfc (lane 0)
        # out_ref:  (S, B)
        P = p_ref[...]
        whh0 = P[0:H, :]
        wih1 = P[H:2 * H, :]
        whh1 = P[2 * H:3 * H, :]
        b0 = P[3 * H:3 * H + 1, :]
        b1 = P[3 * H + 1:3 * H + 2, :]
        wfc = P[3 * H + 2:3 * H + 3, 0:H]          # (1, H)
        bfc = P[3 * H + 3:3 * H + 4, 0:1]          # (1, 1)

        # Hoist loop-invariant broadcasts once (not re-emitted per step).
        def rows(w):
            return [jnp.broadcast_to(w[k:k + 1, :], (B, G)) for k in range(H)]

        whh0_r = rows(whh0)
        wih1_r = rows(wih1)
        whh1_r = rows(whh1)
        b1_b = jnp.broadcast_to(b1, (B, G))

        # Hoisted layer-0 input projection: the only matmul with a real
        # contraction (K = 73), one MXU dot off the recurrent critical path.
        xp0 = (jnp.dot(x_ref[...], wih0_ref[...],
                       preferred_element_type=jnp.float32) + b0)
        xp0 = xp0.reshape(S, B, G)   # per-step access is leading-axis (free)

        # t == 0: all states are zero -> drop recurrent terms and f*c_prev.
        h0, c0 = activate(xp0[0], None)
        h1, c1 = activate(small_matmul(h0, wih1_r) + b1_b, None)
        h1_steps = [h1]

        # Fully static unroll (S fixed & small) so the scheduler sees across
        # timesteps / layers.
        for t in range(1, S):
            pre0 = xp0[t] + small_matmul(h0, whh0_r)
            h0, c0 = activate(pre0, c0)
            pre1 = small_matmul(h0, wih1_r) + small_matmul(h1, whh1_r) + b1_b
            h1, c1 = activate(pre1, c1)
            h1_steps.append(h1)

        # Final Linear on the VPU.  Each h1 is exactly one vreg / one sublane
        # group, so the leading-axis stack is layout-free (no sublane-shift
        # concat, no end-of-kernel MXU FIFO round trip).
        hs = jnp.stack(h1_steps, axis=0)                          # (S, B, H)
        out = jnp.sum(hs * wfc.reshape(1, 1, H), axis=-1) + bfc   # (S, B)
        out_ref[...] = out

    return kernel


def lstm_forward(x, packed):
    # x: (S, B, I), seq-major like PyTorch nn.LSTM with batch_first=False.
    S, B, I = x.shape
    H, O = HIDDEN_SIZE, OUTPUT_SIZE
    # Pad batch to one f32 sublane group so per-step slicing inside the kernel
    # stays on whole-vreg / leading-axis boundaries (zero extra compute cost).
    x_p = jnp.zeros((S, B_PAD, I), x.dtype).at[:, :B, :].set(x)
    x_flat = x_p.reshape(S * B_PAD, I)

    vmem = pl.BlockSpec(memory_space=pltpu.MemorySpace.VMEM)
    # TODO(synk): if this forward is invoked repeatedly (e.g. per decode
    # step), keep the constant weights VMEM-resident across calls (cross-call
    # prefetch / input_output_aliases for h,c state) instead of re-DMAing.
    # Note: a single tiny sequence cannot use v7x's second TensorCore; batch
    # independent sequences over a "parallel" grid axis for that.
    out = pl.pallas_call(
        _make_lstm_kernel(S, B_PAD, H),
        out_shape=jax.ShapeDtypeStruct((S, B_PAD), jnp.float32),
        in_specs=[vmem, vmem, vmem],
        out_specs=vmem,
    )(x_flat, packed["wih0"], packed["small"])
    return out[:, :B].reshape(S, B, O)


def init_params(key):
    """Deterministic PyTorch-layout params, then repack for the kernel."""
    H, I, O = HIDDEN_SIZE, INPUT_SIZE, OUTPUT_SIZE
    bound = 1.0 / jnp.sqrt(H)
    keys = jax.random.split(key, 10)
    u = lambda k, shape: jax.random.uniform(k, shape, jnp.float32, -bound, bound)

    raw = {
        # layer 0 (input_size -> hidden)
        "w_ih_0": u(keys[0], (4 * H, I)),
        "w_hh_0": u(keys[1], (4 * H, H)),
        "b_ih_0": u(keys[2], (4 * H,)),
        "b_hh_0": u(keys[3], (4 * H,)),
        # layer 1 (hidden -> hidden)
        "w_ih_1": u(keys[4], (4 * H, H)),
        "w_hh_1": u(keys[5], (4 * H, H)),
        "b_ih_1": u(keys[6], (4 * H,)),
        "b_hh_1": u(keys[7], (4 * H,)),
        # final Linear
        "w_fc": u(keys[8], (O, H)),
        "b_fc": u(keys[9], (O,)),
    }

    def pack_w(w):
        # PyTorch rows ordered (i, f, g, o) -> columns ordered (f, o, i, g),
        # sigmoid-gate columns pre-scaled by 0.5 (single-tanh activation).
        i, f, g, o = (w[k * H:(k + 1) * H, :] for k in range(4))
        return jnp.concatenate([0.5 * f, 0.5 * o, 0.5 * i, g], axis=0).T

    def pack_b(b_ih, b_hh):
        # combined bias, reordered to (f, o, i, g), sigmoid parts scaled 0.5
        b = b_ih + b_hh
        i, f, g, o = (b[k * H:(k + 1) * H] for k in range(4))
        return jnp.concatenate([0.5 * f, 0.5 * o, 0.5 * i, g])

    G = 4 * H
    small = jnp.zeros((G, G), jnp.float32)
    small = small.at[0:H, :].set(pack_w(raw["w_hh_0"]))
    small = small.at[H:2 * H, :].set(pack_w(raw["w_ih_1"]))
    small = small.at[2 * H:3 * H, :].set(pack_w(raw["w_hh_1"]))
    small = small.at[3 * H, :].set(pack_b(raw["b_ih_0"], raw["b_hh_0"]))
    small = small.at[3 * H + 1, :].set(pack_b(raw["b_ih_1"], raw["b_hh_1"]))
    small = small.at[3 * H + 2, 0:H].set(raw["w_fc"][0, :])
    small = small.at[3 * H + 3, 0].set(raw["b_fc"][0])

    packed = {"wih0": pack_w(raw["w_ih_0"]), "small": small}
    return raw, packed


def lstm_reference(x, raw):
    """Pure-JAX replica of the PyTorch module forward (for verification)."""
    H = HIDDEN_SIZE
    S, B, _ = x.shape

    def cell(x_t, h, c, w_ih, w_hh, b_ih, b_hh):
        gates = x_t @ w_ih.T + b_ih + h @ w_hh.T + b_hh
        i, f, g, o = jnp.split(gates, 4, axis=-1)
        i = jax.nn.sigmoid(i)
        f = jax.nn.sigmoid(f)
        g = jnp.tanh(g)
        o = jax.nn.sigmoid(o)
        c = f * c + i * g
        h = o * jnp.tanh(c)
        return h, c

    h = [jnp.zeros((B, H), jnp.float32) for _ in range(NUM_LAYERS)]
    c = [jnp.zeros((B, H), jnp.float32) for _ in range(NUM_LAYERS)]
    outs = []
    for t in range(S):
        inp = x[t]
        for l in range(NUM_LAYERS):
            h[l], c[l] = cell(inp, h[l], c[l],
                              raw[f"w_ih_{l}"], raw[f"w_hh_{l}"],
                              raw[f"b_ih_{l}"], raw[f"b_hh_{l}"])
            inp = h[l]
        outs.append(inp @ raw["w_fc"].T + raw["b_fc"])
    return jnp.stack(outs, axis=0)  # (S, B, O)


if __name__ == "__main__":
    key = jax.random.PRNGKey(0)
    k_param, k_x = jax.random.split(key)
    raw, packed = init_params(k_param)

    S, B = 8, 2
    x = jax.random.normal(k_x, (S, B, INPUT_SIZE), dtype=jnp.float32)

    out = lstm_forward(x, packed)
    out = jax.block_until_ready(out)

    ref = lstm_reference(x, raw)
    assert out.shape == (S, B, OUTPUT_SIZE), out.shape
    assert jnp.allclose(out, ref, rtol=1e-4, atol=1e-5), (
        float(jnp.max(jnp.abs(out - ref))))

    print("KERNEL_OK")
</pallas_src>

<mosaic_0001>
module attributes {stable_mosaic.version = 11 : i64} {
  func.func @kernel(%arg0: memref<64x73xf32, #tpu.memory_space<vmem>>, %arg1: memref<73x16xf32, #tpu.memory_space<vmem>>, %arg2: memref<16x16xf32, #tpu.memory_space<vmem>>, %arg3: memref<8x8xf32, #tpu.memory_space<vmem>>) attributes {dimension_semantics = [], scalar_prefetch = 0 : i64, scratch_operands = 0 : i64, tpu.core_type = #tpu.core_type<tc>} {
    %c0 = arith.constant 0 : index
    %c0_0 = arith.constant 0 : index
    %0 = vector.load %arg2[%c0, %c0_0] : memref<16x16xf32, #tpu.memory_space<vmem>>, vector<16x16xf32>
    %1 = vector.extract_strided_slice %0 {offsets = [0, 0], sizes = [4, 16], strides = [1, 1]} : vector<16x16xf32> to vector<4x16xf32>
    %2 = vector.extract_strided_slice %0 {offsets = [4, 0], sizes = [4, 16], strides = [1, 1]} : vector<16x16xf32> to vector<4x16xf32>
    %3 = vector.extract_strided_slice %0 {offsets = [8, 0], sizes = [4, 16], strides = [1, 1]} : vector<16x16xf32> to vector<4x16xf32>
    %4 = vector.extract_strided_slice %0 {offsets = [12, 0], sizes = [1, 16], strides = [1, 1]} : vector<16x16xf32> to vector<1x16xf32>
    %5 = vector.extract_strided_slice %0 {offsets = [13, 0], sizes = [1, 16], strides = [1, 1]} : vector<16x16xf32> to vector<1x16xf32>
    %6 = vector.extract_strided_slice %0 {offsets = [14, 0], sizes = [1, 4], strides = [1, 1]} : vector<16x16xf32> to vector<1x4xf32>
    %7 = vector.extract_strided_slice %0 {offsets = [15, 0], sizes = [1, 1], strides = [1, 1]} : vector<16x16xf32> to vector<1x1xf32>
    %8 = vector.extract_strided_slice %1 {offsets = [0, 0], sizes = [1, 16], strides = [1, 1]} : vector<4x16xf32> to vector<1x16xf32>
    %9 = vector.shape_cast %8 : vector<1x16xf32> to vector<1x16xf32>
    %10 = vector.broadcast %9 : vector<1x16xf32> to vector<8x16xf32>
    %11 = vector.extract_strided_slice %1 {offsets = [1, 0], sizes = [1, 16], strides = [1, 1]} : vector<4x16xf32> to vector<1x16xf32>
    %12 = vector.shape_cast %11 : vector<1x16xf32> to vector<1x16xf32>
    %13 = vector.broadcast %12 : vector<1x16xf32> to vector<8x16xf32>
    %14 = vector.extract_strided_slice %1 {offsets = [2, 0], sizes = [1, 16], strides = [1, 1]} : vector<4x16xf32> to vector<1x16xf32>
    %15 = vector.shape_cast %14 : vector<1x16xf32> to vector<1x16xf32>
    %16 = vector.broadcast %15 : vector<1x16xf32> to vector<8x16xf32>
    %17 = vector.extract_strided_slice %1 {offsets = [3, 0], sizes = [1, 16], strides = [1, 1]} : vector<4x16xf32> to vector<1x16xf32>
    %18 = vector.shape_cast %17 : vector<1x16xf32> to vector<1x16xf32>
    %19 = vector.broadcast %18 : vector<1x16xf32> to vector<8x16xf32>
    %20 = vector.extract_strided_slice %2 {offsets = [0, 0], sizes = [1, 16], strides = [1, 1]} : vector<4x16xf32> to vector<1x16xf32>
    %21 = vector.shape_cast %20 : vector<1x16xf32> to vector<1x16xf32>
    %22 = vector.broadcast %21 : vector<1x16xf32> to vector<8x16xf32>
    %23 = vector.extract_strided_slice %2 {offsets = [1, 0], sizes = [1, 16], strides = [1, 1]} : vector<4x16xf32> to vector<1x16xf32>
    %24 = vector.shape_cast %23 : vector<1x16xf32> to vector<1x16xf32>
    %25 = vector.broadcast %24 : vector<1x16xf32> to vector<8x16xf32>
    %26 = vector.extract_strided_slice %2 {offsets = [2, 0], sizes = [1, 16], strides = [1, 1]} : vector<4x16xf32> to vector<1x16xf32>
    %27 = vector.shape_cast %26 : vector<1x16xf32> to vector<1x16xf32>
    %28 = vector.broadcast %27 : vector<1x16xf32> to vector<8x16xf32>
    %29 = vector.extract_strided_slice %2 {offsets = [3, 0], sizes = [1, 16], strides = [1, 1]} : vector<4x16xf32> to vector<1x16xf32>
    %30 = vector.shape_cast %29 : vector<1x16xf32> to vector<1x16xf32>
    %31 = vector.broadcast %30 : vector<1x16xf32> to vector<8x16xf32>
    %32 = vector.extract_strided_slice %3 {offsets = [0, 0], sizes = [1, 16], strides = [1, 1]} : vector<4x16xf32> to vector<1x16xf32>
    %33 = vector.shape_cast %32 : vector<1x16xf32> to vector<1x16xf32>
    %34 = vector.broadcast %33 : vector<1x16xf32> to vector<8x16xf32>
    %35 = vector.extract_strided_slice %3 {offsets = [1, 0], sizes = [1, 16], strides = [1, 1]} : vector<4x16xf32> to vector<1x16xf32>
    %36 = vector.shape_cast %35 : vector<1x16xf32> to vector<1x16xf32>
    %37 = vector.broadcast %36 : vector<1x16xf32> to vector<8x16xf32>
    %38 = vector.extract_strided_slice %3 {offsets = [2, 0], sizes = [1, 16], strides = [1, 1]} : vector<4x16xf32> to vector<1x16xf32>
    %39 = vector.shape_cast %38 : vector<1x16xf32> to vector<1x16xf32>
    %40 = vector.broadcast %39 : vector<1x16xf32> to vector<8x16xf32>
    %41 = vector.extract_strided_slice %3 {offsets = [3, 0], sizes = [1, 16], strides = [1, 1]} : vector<4x16xf32> to vector<1x16xf32>
    %42 = vector.shape_cast %41 : vector<1x16xf32> to vector<1x16xf32>
    %43 = vector.broadcast %42 : vector<1x16xf32> to vector<8x16xf32>
    %44 = vector.shape_cast %5 : vector<1x16xf32> to vector<1x16xf32>
    %45 = vector.broadcast %44 : vector<1x16xf32> to vector<8x16xf32>
    %c0_1 = arith.constant 0 : index
    %c0_2 = arith.constant 0 : index
    %46 = vector.load %arg0[%c0_1, %c0_2] : memref<64x73xf32, #tpu.memory_space<vmem>>, vector<64x73xf32>
    %c0_3 = arith.constant 0 : index
    %c0_4 = arith.constant 0 : index
    %47 = vector.load %arg1[%c0_3, %c0_4] : memref<73x16xf32, #tpu.memory_space<vmem>>, vector<73x16xf32>
    %cst = arith.constant dense<0.000000e+00> : vector<64x16xf32>
    %48 = tpu.matmul %46, %47, %cst {dimension_numbers = #tpu.dot_dimension_numbers<[1], [0], [0], [1], [0, 0, 1, 1], [], []>} : vector<64x73xf32>, vector<73x16xf32>, vector<64x16xf32> -> vector<64x16xf32>
    %49 = vector.broadcast %4 : vector<1x16xf32> to vector<64x16xf32>
    %50 = arith.addf %48, %49 : vector<64x16xf32>
    %51 = vector.shape_cast %50 : vector<64x16xf32> to vector<8x8x16xf32>
    %52 = vector.extract_strided_slice %51 {offsets = [0, 0, 0], sizes = [1, 8, 16], strides = [1, 1, 1]} : vector<8x8x16xf32> to vector<1x8x16xf32>
    %53 = vector.shape_cast %52 : vector<1x8x16xf32> to vector<8x16xf32>
    %54 = math.tanh %53 : vector<8x16xf32>
    %55 = vector.extract_strided_slice %54 {offsets = [0, 0], sizes = [8, 12], strides = [1, 1]} : vector<8x16xf32> to vector<8x12xf32>
    %cst_5 = arith.constant 5.000000e-01 : f32
    %56 = vector.broadcast %cst_5 : f32 to vector<8x12xf32>
    %57 = arith.mulf %56, %55 : vector<8x12xf32>
    %cst_6 = arith.constant 5.000000e-01 : f32
    %58 = vector.broadcast %cst_6 : f32 to vector<8x12xf32>
    %59 = arith.addf %57, %58 : vector<8x12xf32>
    %60 = vector.extract_strided_slice %59 {offsets = [0, 4], sizes = [8, 4], strides = [1, 1]} : vector<8x12xf32> to vector<8x4xf32>
    %61 = vector.extract_strided_slice %59 {offsets = [0, 8], sizes = [8, 4], strides = [1, 1]} : vector<8x12xf32> to vector<8x4xf32>
    %62 = vector.extract_strided_slice %54 {offsets = [0, 12], sizes = [8, 4], strides = [1, 1]} : vector<8x16xf32> to vector<8x4xf32>
    %63 = arith.mulf %61, %62 : vector<8x4xf32>
    %64 = math.tanh %63 : vector<8x4xf32>
    %65 = arith.mulf %60, %64 : vector<8x4xf32>
    %66 = vector.extract_strided_slice %65 {offsets = [0, 0], sizes = [8, 1], strides = [1, 1]} : vector<8x4xf32> to vector<8x1xf32>
    %67 = vector.broadcast %66 : vector<8x1xf32> to vector<8x16xf32>
    %68 = arith.mulf %67, %22 : vector<8x16xf32>
    %69 = vector.extract_strided_slice %65 {offsets = [0, 1], sizes = [8, 1], strides = [1, 1]} : vector<8x4xf32> to vector<8x1xf32>
    %70 = vector.broadcast %69 : vector<8x1xf32> to vector<8x16xf32>
    %71 = arith.mulf %70, %25 : vector<8x16xf32>
    %72 = arith.addf %68, %71 : vector<8x16xf32>
    %73 = vector.extract_strided_slice %65 {offsets = [0, 2], sizes = [8, 1], strides = [1, 1]} : vector<8x4xf32> to vector<8x1xf32>
    %74 = vector.broadcast %73 : vector<8x1xf32> to vector<8x16xf32>
    %75 = arith.mulf %74, %28 : vector<8x16xf32>
    %76 = arith.addf %72, %75 : vector<8x16xf32>
    %77 = vector.extract_strided_slice %65 {offsets = [0, 3], sizes = [8, 1], strides = [1, 1]} : vector<8x4xf32> to vector<8x1xf32>
    %78 = vector.broadcast %77 : vector<8x1xf32> to vector<8x16xf32>
    %79 = arith.mulf %78, %31 : vector<8x16xf32>
    %80 = arith.addf %76, %79 : vector<8x16xf32>
    %81 = arith.addf %80, %45 : vector<8x16xf32>
    %82 = math.tanh %81 : vector<8x16xf32>
    %83 = vector.extract_strided_slice %82 {offsets = [0, 0], sizes = [8, 12], strides = [1, 1]} : vector<8x16xf32> to vector<8x12xf32>
    %cst_7 = arith.constant 5.000000e-01 : f32
    %84 = vector.broadcast %cst_7 : f32 to vector<8x12xf32>
    %85 = arith.mulf %84, %83 : vector<8x12xf32>
    %cst_8 = arith.constant 5.000000e-01 : f32
    %86 = vector.broadcast %cst_8 : f32 to vector<8x12xf32>
    %87 = arith.addf %85, %86 : vector<8x12xf32>
    %88 = vector.extract_strided_slice %87 {offsets = [0, 4], sizes = [8, 4], strides = [1, 1]} : vector<8x12xf32> to vector<8x4xf32>
    %89 = vector.extract_strided_slice %87 {offsets = [0, 8], sizes = [8, 4], strides = [1, 1]} : vector<8x12xf32> to vector<8x4xf32>
    %90 = vector.extract_strided_slice %82 {offsets = [0, 12], sizes = [8, 4], strides = [1, 1]} : vector<8x16xf32> to vector<8x4xf32>
    %91 = arith.mulf %89, %90 : vector<8x4xf32>
    %92 = math.tanh %91 : vector<8x4xf32>
    %93 = arith.mulf %88, %92 : vector<8x4xf32>
    %94 = vector.extract_strided_slice %51 {offsets = [1, 0, 0], sizes = [1, 8, 16], strides = [1, 1, 1]} : vector<8x8x16xf32> to vector<1x8x16xf32>
    %95 = vector.shape_cast %94 : vector<1x8x16xf32> to vector<8x16xf32>
    %96 = vector.extract_strided_slice %65 {offsets = [0, 0], sizes = [8, 1], strides = [1, 1]} : vector<8x4xf32> to vector<8x1xf32>
    %97 = vector.broadcast %96 : vector<8x1xf32> to vector<8x16xf32>
    %98 = arith.mulf %97, %10 : vector<8x16xf32>
    %99 = vector.extract_strided_slice %65 {offsets = [0, 1], sizes = [8, 1], strides = [1, 1]} : vector<8x4xf32> to vector<8x1xf32>
    %100 = vector.broadcast %99 : vector<8x1xf32> to vector<8x16xf32>
    %101 = arith.mulf %100, %13 : vector<8x16xf32>
    %102 = arith.addf %98, %101 : vector<8x16xf32>
    %103 = vector.extract_strided_slice %65 {offsets = [0, 2], sizes = [8, 1], strides = [1, 1]} : vector<8x4xf32> to vector<8x1xf32>
    %104 = vector.broadcast %103 : vector<8x1xf32> to vector<8x16xf32>
    %105 = arith.mulf %104, %16 : vector<8x16xf32>
    %106 = arith.addf %102, %105 : vector<8x16xf32>
    %107 = vector.extract_strided_slice %65 {offsets = [0, 3], sizes = [8, 1], strides = [1, 1]} : vector<8x4xf32> to vector<8x1xf32>
    %108 = vector.broadcast %107 : vector<8x1xf32> to vector<8x16xf32>
    %109 = arith.mulf %108, %19 : vector<8x16xf32>
    %110 = arith.addf %106, %109 : vector<8x16xf32>
    %111 = arith.addf %95, %110 : vector<8x16xf32>
    %112 = math.tanh %111 : vector<8x16xf32>
    %113 = vector.extract_strided_slice %112 {offsets = [0, 0], sizes = [8, 12], strides = [1, 1]} : vector<8x16xf32> to vector<8x12xf32>
    %cst_9 = arith.constant 5.000000e-01 : f32
    %114 = vector.broadcast %cst_9 : f32 to vector<8x12xf32>
    %115 = arith.mulf %114, %113 : vector<8x12xf32>
    %cst_10 = arith.constant 5.000000e-01 : f32
    %116 = vector.broadcast %cst_10 : f32 to vector<8x12xf32>
    %117 = arith.addf %115, %116 : vector<8x12xf32>
    %118 = vector.extract_strided_slice %117 {offsets = [0, 0], sizes = [8, 4], strides = [1, 1]} : vector<8x12xf32> to vector<8x4xf32>
    %119 = vector.extract_strided_slice %117 {offsets = [0, 4], sizes = [8, 4], strides = [1, 1]} : vector<8x12xf32> to vector<8x4xf32>
    %120 = vector.extract_strided_slice %117 {offsets = [0, 8], sizes = [8, 4], strides = [1, 1]} : vector<8x12xf32> to vector<8x4xf32>
    %121 = vector.extract_strided_slice %112 {offsets = [0, 12], sizes = [8, 4], strides = [1, 1]} : vector<8x16xf32> to vector<8x4xf32>
    %122 = arith.mulf %118, %63 : vector<8x4xf32>
    %123 = arith.mulf %120, %121 : vector<8x4xf32>
    %124 = arith.addf %122, %123 : vector<8x4xf32>
    %125 = math.tanh %124 : vector<8x4xf32>
    %126 = arith.mulf %119, %125 : vector<8x4xf32>
    %127 = vector.extract_strided_slice %126 {offsets = [0, 0], sizes = [8, 1], strides = [1, 1]} : vector<8x4xf32> to vector<8x1xf32>
    %128 = vector.broadcast %127 : vector<8x1xf32> to vector<8x16xf32>
    %129 = arith.mulf %128, %22 : vector<8x16xf32>
    %130 = vector.extract_strided_slice %126 {offsets = [0, 1], sizes = [8, 1], strides = [1, 1]} : vector<8x4xf32> to vector<8x1xf32>
    %131 = vector.broadcast %130 : vector<8x1xf32> to vector<8x16xf32>
    %132 = arith.mulf %131, %25 : vector<8x16xf32>
    %133 = arith.addf %129, %132 : vector<8x16xf32>
    %134 = vector.extract_strided_slice %126 {offsets = [0, 2], sizes = [8, 1], strides = [1, 1]} : vector<8x4xf32> to vector<8x1xf32>
    %135 = vector.broadcast %134 : vector<8x1xf32> to vector<8x16xf32>
    %136 = arith.mulf %135, %28 : vector<8x16xf32>
    %137 = arith.addf %133, %136 : vector<8x16xf32>
    %138 = vector.extract_strided_slice %126 {offsets = [0, 3], sizes = [8, 1], strides = [1, 1]} : vector<8x4xf32> to vector<8x1xf32>
    %139 = vector.broadcast %138 : vector<8x1xf32> to vector<8x16xf32>
    %140 = arith.mulf %139, %31 : vector<8x16xf32>
    %141 = arith.addf %137, %140 : vector<8x16xf32>
    %142 = vector.extract_strided_slice %93 {offsets = [0, 0], sizes = [8, 1], strides = [1, 1]} : vector<8x4xf32> to vector<8x1xf32>
    %143 = vector.broadcast %142 : vector<8x1xf32> to vector<8x16xf32>
    %144 = arith.mulf %143, %34 : vector<8x16xf32>
    %145 = vector.extract_strided_slice %93 {offsets = [0, 1], sizes = [8, 1], strides = [1, 1]} : vector<8x4xf32> to vector<8x1xf32>
    %146 = vector.broadcast %145 : vector<8x1xf32> to vector<8x16xf32>
    %147 = arith.mulf %146, %37 : vector<8x16xf32>
    %148 = arith.addf %144, %147 : vector<8x16xf32>
    %149 = vector.extract_strided_slice %93 {offsets = [0, 2], sizes = [8, 1], strides = [1, 1]} : vector<8x4xf32> to vector<8x1xf32>
    %150 = vector.broadcast %149 : vector<8x1xf32> to vector<8x16xf32>
    %151 = arith.mulf %150, %40 : vector<8x16xf32>
    %152 = arith.addf %148, %151 : vector<8x16xf32>
    %153 = vector.extract_strided_slice %93 {offsets = [0, 3], sizes = [8, 1], strides = [1, 1]} : vector<8x4xf32> to vector<8x1xf32>
    %154 = vector.broadcast %153 : vector<8x1xf32> to vector<8x16xf32>
    %155 = arith.mulf %154, %43 : vector<8x16xf32>
    %156 = arith.addf %152, %155 : vector<8x16xf32>
    %157 = arith.addf %141, %156 : vector<8x16xf32>
    %158 = arith.addf %157, %45 : vector<8x16xf32>
    %159 = math.tanh %158 : vector<8x16xf32>
    %160 = vector.extract_strided_slice %159 {offsets = [0, 0], sizes = [8, 12], strides = [1, 1]} : vector<8x16xf32> to vector<8x12xf32>
    %cst_11 = arith.constant 5.000000e-01 : f32
    %161 = vector.broadcast %cst_11 : f32 to vector<8x12xf32>
    %162 = arith.mulf %161, %160 : vector<8x12xf32>
    %cst_12 = arith.constant 5.000000e-01 : f32
    %163 = vector.broadcast %cst_12 : f32 to vector<8x12xf32>
    %164 = arith.addf %162, %163 : vector<8x12xf32>
    %165 = vector.extract_strided_slice %164 {offsets = [0, 0], sizes = [8, 4], strides = [1, 1]} : vector<8x12xf32> to vector<8x4xf32>
    %166 = vector.extract_strided_slice %164 {offsets = [0, 4], sizes = [8, 4], strides = [1, 1]} : vector<8x12xf32> to vector<8x4xf32>
    %167 = vector.extract_strided_slice %164 {offsets = [0, 8], sizes = [8, 4], strides = [1, 1]} : vector<8x12xf32> to vector<8x4xf32>
    %168 = vector.extract_strided_slice %159 {offsets = [0, 12], sizes = [8, 4], strides = [1, 1]} : vector<8x16xf32> to vector<8x4xf32>
    %169 = arith.mulf %165, %91 : vector<8x4xf32>
    %170 = arith.mulf %167, %168 : vector<8x4xf32>
    %171 = arith.addf %169, %170 : vector<8x4xf32>
    %172 = math.tanh %171 : vector<8x4xf32>
    %173 = arith.mulf %166, %172 : vector<8x4xf32>
    %174 = vector.extract_strided_slice %51 {offsets = [2, 0, 0], sizes = [1, 8, 16], strides = [1, 1, 1]} : vector<8x8x16xf32> to vector<1x8x16xf32>
    %175 = vector.shape_cast %174 : vector<1x8x16xf32> to vector<8x16xf32>
    %176 = vector.extract_strided_slice %126 {offsets = [0, 0], sizes = [8, 1], strides = [1, 1]} : vector<8x4xf32> to vector<8x1xf32>
    %177 = vector.broadcast %176 : vector<8x1xf32> to vector<8x16xf32>
    %178 = arith.mulf %177, %10 : vector<8x16xf32>
    %179 = vector.extract_strided_slice %126 {offsets = [0, 1], sizes = [8, 1], strides = [1, 1]} : vector<8x4xf32> to vector<8x1xf32>
    %180 = vector.broadcast %179 : vector<8x1xf32> to vector<8x16xf32>
    %181 = arith.mulf %180, %13 : vector<8x16xf32>
    %182 = arith.addf %178, %181 : vector<8x16xf32>
    %183 = vector.extract_strided_slice %126 {offsets = [0, 2], sizes = [8, 1], strides = [1, 1]} : vector<8x4xf32> to vector<8x1xf32>
    %184 = vector.broadcast %183 : vector<8x1xf32> to vector<8x16xf32>
    %185 = arith.mulf %184, %16 : vector<8x16xf32>
    %186 = arith.addf %182, %185 : vector<8x16xf32>
    %187 = vector.extract_strided_slice %126 {offsets = [0, 3], sizes = [8, 1], strides = [1, 1]} : vector<8x4xf32> to vector<8x1xf32>
    %188 = vector.broadcast %187 : vector<8x1xf32> to vector<8x16xf32>
    %189 = arith.mulf %188, %19 : vector<8x16xf32>
    %190 = arith.addf %186, %189 : vector<8x16xf32>
    %191 = arith.addf %175, %190 : vector<8x16xf32>
    %192 = math.tanh %191 : vector<8x16xf32>
    %193 = vector.extract_strided_slice %192 {offsets = [0, 0], sizes = [8, 12], strides = [1, 1]} : vector<8x16xf32> to vector<8x12xf32>
    %cst_13 = arith.constant 5.000000e-01 : f32
    %194 = vector.broadcast %cst_13 : f32 to vector<8x12xf32>
    %195 = arith.mulf %194, %193 : vector<8x12xf32>
    %cst_14 = arith.constant 5.000000e-01 : f32
    %196 = vector.broadcast %cst_14 : f32 to vector<8x12xf32>
    %197 = arith.addf %195, %196 : vector<8x12xf32>
    %198 = vector.extract_strided_slice %197 {offsets = [0, 0], sizes = [8, 4], strides = [1, 1]} : vector<8x12xf32> to vector<8x4xf32>
    %199 = vector.extract_strided_slice %197 {offsets = [0, 4], sizes = [8, 4], strides = [1, 1]} : vector<8x12xf32> to vector<8x4xf32>
    %200 = vector.extract_strided_slice %197 {offsets = [0, 8], sizes = [8, 4], strides = [1, 1]} : vector<8x12xf32> to vector<8x4xf32>
    %201 = vector.extract_strided_slice %192 {offsets = [0, 12], sizes = [8, 4], strides = [1, 1]} : vector<8x16xf32> to vector<8x4xf32>
    %202 = arith.mulf %198, %124 : vector<8x4xf32>
    %203 = arith.mulf %200, %201 : vector<8x4xf32>
    %204 = arith.addf %202, %203 : vector<8x4xf32>
    %205 = math.tanh %204 : vector<8x4xf32>
    %206 = arith.mulf %199, %205 : vector<8x4xf32>
    %207 = vector.extract_strided_slice %206 {offsets = [0, 0], sizes = [8, 1], strides = [1, 1]} : vector<8x4xf32> to vector<8x1xf32>
    %208 = vector.broadcast %207 : vector<8x1xf32> to vector<8x16xf32>
    %209 = arith.mulf %208, %22 : vector<8x16xf32>
    %210 = vector.extract_strided_slice %206 {offsets = [0, 1], sizes = [8, 1], strides = [1, 1]} : vector<8x4xf32> to vector<8x1xf32>
    %211 = vector.broadcast %210 : vector<8x1xf32> to vector<8x16xf32>
    %212 = arith.mulf %211, %25 : vector<8x16xf32>
    %213 = arith.addf %209, %212 : vector<8x16xf32>
    %214 = vector.extract_strided_slice %206 {offsets = [0, 2], sizes = [8, 1], strides = [1, 1]} : vector<8x4xf32> to vector<8x1xf32>
    %215 = vector.broadcast %214 : vector<8x1xf32> to vector<8x16xf32>
    %216 = arith.mulf %215, %28 : vector<8x16xf32>
    %217 = arith.addf %213, %216 : vector<8x16xf32>
    %218 = vector.extract_strided_slice %206 {offsets = [0, 3], sizes = [8, 1], strides = [1, 1]} : vector<8x4xf32> to vector<8x1xf32>
    %219 = vector.broadcast %218 : vector<8x1xf32> to vector<8x16xf32>
    %220 = arith.mulf %219, %31 : vector<8x16xf32>
    %221 = arith.addf %217, %220 : vector<8x16xf32>
    %222 = vector.extract_strided_slice %173 {offsets = [0, 0], sizes = [8, 1], strides = [1, 1]} : vector<8x4xf32> to vector<8x1xf32>
    %223 = vector.broadcast %222 : vector<8x1xf32> to vector<8x16xf32>
    %224 = arith.mulf %223, %34 : vector<8x16xf32>
    %225 = vector.extract_strided_slice %173 {offsets = [0, 1], sizes = [8, 1], strides = [1, 1]} : vector<8x4xf32> to vector<8x1xf32>
    %226 = vector.broadcast %225 : vector<8x1xf32> to vector<8x16xf32>
    %227 = arith.mulf %226, %37 : vector<8x16xf32>
    %228 = arith.addf %224, %227 : vector<8x16xf32>
    %229 = vector.extract_strided_slice %173 {offsets = [0, 2], sizes = [8, 1], strides = [1, 1]} : vector<8x4xf32> to vector<8x1xf32>
    %230 = vector.broadcast %229 : vector<8x1xf32> to vector<8x16xf32>
    %231 = arith.mulf %230, %40 : vector<8x16xf32>
    %232 = arith.addf %228, %231 : vector<8x16xf32>
    %233 = vector.extract_strided_slice %173 {offsets = [0, 3], sizes = [8, 1], strides = [1, 1]} : vector<8x4xf32> to vector<8x1xf32>
    %234 = vector.broadcast %233 : vector<8x1xf32> to vector<8x16xf32>
    %235 = arith.mulf %234, %43 : vector<8x16xf32>
    %236 = arith.addf %232, %235 : vector<8x16xf32>
    %237 = arith.addf %221, %236 : vector<8x16xf32>
    %238 = arith.addf %237, %45 : vector<8x16xf32>
    %239 = math.tanh %238 : vector<8x16xf32>
    %240 = vector.extract_strided_slice %239 {offsets = [0, 0], sizes = [8, 12], strides = [1, 1]} : vector<8x16xf32> to vector<8x12xf32>
    %cst_15 = arith.constant 5.000000e-01 : f32
    %241 = vector.broadcast %cst_15 : f32 to vector<8x12xf32>
    %242 = arith.mulf %241, %240 : vector<8x12xf32>
    %cst_16 = arith.constant 5.000000e-01 : f32
    %243 = vector.broadcast %cst_16 : f32 to vector<8x12xf32>
    %244 = arith.addf %242, %243 : vector<8x12xf32>
    %245 = vector.extract_strided_slice %244 {offsets = [0, 0], sizes = [8, 4], strides = [1, 1]} : vector<8x12xf32> to vector<8x4xf32>
    %246 = vector.extract_strided_slice %244 {offsets = [0, 4], sizes = [8, 4], strides = [1, 1]} : vector<8x12xf32> to vector<8x4xf32>
    %247 = vector.extract_strided_slice %244 {offsets = [0, 8], sizes = [8, 4], strides = [1, 1]} : vector<8x12xf32> to vector<8x4xf32>
    %248 = vector.extract_strided_slice %239 {offsets = [0, 12], sizes = [8, 4], strides = [1, 1]} : vector<8x16xf32> to vector<8x4xf32>
    %249 = arith.mulf %245, %171 : vector<8x4xf32>
    %250 = arith.mulf %247, %248 : vector<8x4xf32>
    %251 = arith.addf %249, %250 : vector<8x4xf32>
    %252 = math.tanh %251 : vector<8x4xf32>
    %253 = arith.mulf %246, %252 : vector<8x4xf32>
    %254 = vector.extract_strided_slice %51 {offsets = [3, 0, 0], sizes = [1, 8, 16], strides = [1, 1, 1]} : vector<8x8x16xf32> to vector<1x8x16xf32>
    %255 = vector.shape_cast %254 : vector<1x8x16xf32> to vector<8x16xf32>
    %256 = vector.extract_strided_slice %206 {offsets = [0, 0], sizes = [8, 1], strides = [1, 1]} : vector<8x4xf32> to vector<8x1xf32>
    %257 = vector.broadcast %256 : vector<8x1xf32> to vector<8x16xf32>
    %258 = arith.mulf %257, %10 : vector<8x16xf32>
    %259 = vector.extract_strided_slice %206 {offsets = [0, 1], sizes = [8, 1], strides = [1, 1]} : vector<8x4xf32> to vector<8x1xf32>
    %260 = vector.broadcast %259 : vector<8x1xf32> to vector<8x16xf32>
    %261 = arith.mulf %260, %13 : vector<8x16xf32>
    %262 = arith.addf %258, %261 : vector<8x16xf32>
    %263 = vector.extract_strided_slice %206 {offsets = [0, 2], sizes = [8, 1], strides = [1, 1]} : vector<8x4xf32> to vector<8x1xf32>
    %264 = vector.broadcast %263 : vector<8x1xf32> to vector<8x16xf32>
    %265 = arith.mulf %264, %16 : vector<8x16xf32>
    %266 = arith.addf %262, %265 : vector<8x16xf32>
    %267 = vector.extract_strided_slice %206 {offsets = [0, 3], sizes = [8, 1], strides = [1, 1]} : vector<8x4xf32> to vector<8x1xf32>
    %268 = vector.broadcast %267 : vector<8x1xf32> to vector<8x16xf32>
    %269 = arith.mulf %268, %19 : vector<8x16xf32>
    %270 = arith.addf %266, %269 : vector<8x16xf32>
    %271 = arith.addf %255, %270 : vector<8x16xf32>
    %272 = math.tanh %271 : vector<8x16xf32>
    %273 = vector.extract_strided_slice %272 {offsets = [0, 0], sizes = [8, 12], strides = [1, 1]} : vector<8x16xf32> to vector<8x12xf32>
    %cst_17 = arith.constant 5.000000e-01 : f32
    %274 = vector.broadcast %cst_17 : f32 to vector<8x12xf32>
    %275 = arith.mulf %274, %273 : vector<8x12xf32>
    %cst_18 = arith.constant 5.000000e-01 : f32
    %276 = vector.broadcast %cst_18 : f32 to vector<8x12xf32>
    %277 = arith.addf %275, %276 : vector<8x12xf32>
    %278 = vector.extract_strided_slice %277 {offsets = [0, 0], sizes = [8, 4], strides = [1, 1]} : vector<8x12xf32> to vector<8x4xf32>
    %279 = vector.extract_strided_slice %277 {offsets = [0, 4], sizes = [8, 4], strides = [1, 1]} : vector<8x12xf32> to vector<8x4xf32>
    %280 = vector.extract_strided_slice %277 {offsets = [0, 8], sizes = [8, 4], strides = [1, 1]} : vector<8x12xf32> to vector<8x4xf32>
    %281 = vector.extract_strided_slice %272 {offsets = [0, 12], sizes = [8, 4], strides = [1, 1]} : vector<8x16xf32> to vector<8x4xf32>
    %282 = arith.mulf %278, %204 : vector<8x4xf32>
    %283 = arith.mulf %280, %281 : vector<8x4xf32>
    %284 = arith.addf %282, %283 : vector<8x4xf32>
    %285 = math.tanh %284 : vector<8x4xf32>
    %286 = arith.mulf %279, %285 : vector<8x4xf32>
    %287 = vector.extract_strided_slice %286 {offsets = [0, 0], sizes = [8, 1], strides = [1, 1]} : vector<8x4xf32> to vector<8x1xf32>
    %288 = vector.broadcast %287 : vector<8x1xf32> to vector<8x16xf32>
    %289 = arith.mulf %288, %22 : vector<8x16xf32>
    %290 = vector.extract_strided_slice %286 {offsets = [0, 1], sizes = [8, 1], strides = [1, 1]} : vector<8x4xf32> to vector<8x1xf32>
    %291 = vector.broadcast %290 : vector<8x1xf32> to vector<8x16xf32>
    %292 = arith.mulf %291, %25 : vector<8x16xf32>
    %293 = arith.addf %289, %292 : vector<8x16xf32>
    %294 = vector.extract_strided_slice %286 {offsets = [0, 2], sizes = [8, 1], strides = [1, 1]} : vector<8x4xf32> to vector<8x1xf32>
    %295 = vector.broadcast %294 : vector<8x1xf32> to vector<8x16xf32>
    %296 = arith.mulf %295, %28 : vector<8x16xf32>
    %297 = arith.addf %293, %296 : vector<8x16xf32>
    %298 = vector.extract_strided_slice %286 {offsets = [0, 3], sizes = [8, 1], strides = [1, 1]} : vector<8x4xf32> to vector<8x1xf32>
    %299 = vector.broadcast %298 : vector<8x1xf32> to vector<8x16xf32>
    %300 = arith.mulf %299, %31 : vector<8x16xf32>
    %301 = arith.addf %297, %300 : vector<8x16xf32>
    %302 = vector.extract_strided_slice %253 {offsets = [0, 0], sizes = [8, 1], strides = [1, 1]} : vector<8x4xf32> to vector<8x1xf32>
    %303 = vector.broadcast %302 : vector<8x1xf32> to vector<8x16xf32>
    %304 = arith.mulf %303, %34 : vector<8x16xf32>
    %305 = vector.extract_strided_slice %253 {offsets = [0, 1], sizes = [8, 1], strides = [1, 1]} : vector<8x4xf32> to vector<8x1xf32>
    %306 = vector.broadcast %305 : vector<8x1xf32> to vector<8x16xf32>
    %307 = arith.mulf %306, %37 : vector<8x16xf32>
    %308 = arith.addf %304, %307 : vector<8x16xf32>
    %309 = vector.extract_strided_slice %253 {offsets = [0, 2], sizes = [8, 1], strides = [1, 1]} : vector<8x4xf32> to vector<8x1xf32>
    %310 = vector.broadcast %309 : vector<8x1xf32> to vector<8x16xf32>
    %311 = arith.mulf %310, %40 : vector<8x16xf32>
    %312 = arith.addf %308, %311 : vector<8x16xf32>
    %313 = vector.extract_strided_slice %253 {offsets = [0, 3], sizes = [8, 1], strides = [1, 1]} : vector<8x4xf32> to vector<8x1xf32>
    %314 = vector.broadcast %313 : vector<8x1xf32> to vector<8x16xf32>
    %315 = arith.mulf %314, %43 : vector<8x16xf32>
    %316 = arith.addf %312, %315 : vector<8x16xf32>
    %317 = arith.addf %301, %316 : vector<8x16xf32>
    %318 = arith.addf %317, %45 : vector<8x16xf32>
    %319 = math.tanh %318 : vector<8x16xf32>
    %320 = vector.extract_strided_slice %319 {offsets = [0, 0], sizes = [8, 12], strides = [1, 1]} : vector<8x16xf32> to vector<8x12xf32>
    %cst_19 = arith.constant 5.000000e-01 : f32
    %321 = vector.broadcast %cst_19 : f32 to vector<8x12xf32>
    %322 = arith.mulf %321, %320 : vector<8x12xf32>
    %cst_20 = arith.constant 5.000000e-01 : f32
    %323 = vector.broadcast %cst_20 : f32 to vector<8x12xf32>
    %324 = arith.addf %322, %323 : vector<8x12xf32>
    %325 = vector.extract_strided_slice %324 {offsets = [0, 0], sizes = [8, 4], strides = [1, 1]} : vector<8x12xf32> to vector<8x4xf32>
    %326 = vector.extract_strided_slice %324 {offsets = [0, 4], sizes = [8, 4], strides = [1, 1]} : vector<8x12xf32> to vector<8x4xf32>
    %327 = vector.extract_strided_slice %324 {offsets = [0, 8], sizes = [8, 4], strides = [1, 1]} : vector<8x12xf32> to vector<8x4xf32>
    %328 = vector.extract_strided_slice %319 {offsets = [0, 12], sizes = [8, 4], strides = [1, 1]} : vector<8x16xf32> to vector<8x4xf32>
    %329 = arith.mulf %325, %251 : vector<8x4xf32>
    %330 = arith.mulf %327, %328 : vector<8x4xf32>
    %331 = arith.addf %329, %330 : vector<8x4xf32>
    %332 = math.tanh %331 : vector<8x4xf32>
    %333 = arith.mulf %326, %332 : vector<8x4xf32>
    %334 = vector.extract_strided_slice %51 {offsets = [4, 0, 0], sizes = [1, 8, 16], strides = [1, 1, 1]} : vector<8x8x16xf32> to vector<1x8x16xf32>
    %335 = vector.shape_cast %334 : vector<1x8x16xf32> to vector<8x16xf32>
    %336 = vector.extract_strided_slice %286 {offsets = [0, 0], sizes = [8, 1], strides = [1, 1]} : vector<8x4xf32> to vector<8x1xf32>
    %337 = vector.broadcast %336 : vector<8x1xf32> to vector<8x16xf32>
    %338 = arith.mulf %337, %10 : vector<8x16xf32>
    %339 = vector.extract_strided_slice %286 {offsets = [0, 1], sizes = [8, 1], strides = [1, 1]} : vector<8x4xf32> to vector<8x1xf32>
    %340 = vector.broadcast %339 : vector<8x1xf32> to vector<8x16xf32>
    %341 = arith.mulf %340, %13 : vector<8x16xf32>
    %342 = arith.addf %338, %341 : vector<8x16xf32>
    %343 = vector.extract_strided_slice %286 {offsets = [0, 2], sizes = [8, 1], strides = [1, 1]} : vector<8x4xf32> to vector<8x1xf32>
    %344 = vector.broadcast %343 : vector<8x1xf32> to vector<8x16xf32>
    %345 = arith.mulf %344, %16 : vector<8x16xf32>
    %346 = arith.addf %342, %345 : vector<8x16xf32>
    %347 = vector.extract_strided_slice %286 {offsets = [0, 3], sizes = [8, 1], strides = [1, 1]} : vector<8x4xf32> to vector<8x1xf32>
    %348 = vector.broadcast %347 : vector<8x1xf32> to vector<8x16xf32>
    %349 = arith.mulf %348, %19 : vector<8x16xf32>
    %350 = arith.addf %346, %349 : vector<8x16xf32>
    %351 = arith.addf %335, %350 : vector<8x16xf32>
    %352 = math.tanh %351 : vector<8x16xf32>
    %353 = vector.extract_strided_slice %352 {offsets = [0, 0], sizes = [8, 12], strides = [1, 1]} : vector<8x16xf32> to vector<8x12xf32>
    %cst_21 = arith.constant 5.000000e-01 : f32
    %354 = vector.broadcast %cst_21 : f32 to vector<8x12xf32>
    %355 = arith.mulf %354, %353 : vector<8x12xf32>
    %cst_22 = arith.constant 5.000000e-01 : f32
    %356 = vector.broadcast %cst_22 : f32 to vector<8x12xf32>
    %357 = arith.addf %355, %356 : vector<8x12xf32>
    %358 = vector.extract_strided_slice %357 {offsets = [0, 0], sizes = [8, 4], strides = [1, 1]} : vector<8x12xf32> to vector<8x4xf32>
    %359 = vector.extract_strided_slice %357 {offsets = [0, 4], sizes = [8, 4], strides = [1, 1]} : vector<8x12xf32> to vector<8x4xf32>
    %360 = vector.extract_strided_slice %357 {offsets = [0, 8], sizes = [8, 4], strides = [1, 1]} : vector<8x12xf32> to vector<8x4xf32>
    %361 = vector.extract_strided_slice %352 {offsets = [0, 12], sizes = [8, 4], strides = [1, 1]} : vector<8x16xf32> to vector<8x4xf32>
    %362 = arith.mulf %358, %284 : vector<8x4xf32>
    %363 = arith.mulf %360, %361 : vector<8x4xf32>
    %364 = arith.addf %362, %363 : vector<8x4xf32>
    %365 = math.tanh %364 : vector<8x4xf32>
    %366 = arith.mulf %359, %365 : vector<8x4xf32>
    %367 = vector.extract_strided_slice %366 {offsets = [0, 0], sizes = [8, 1], strides = [1, 1]} : vector<8x4xf32> to vector<8x1xf32>
    %368 = vector.broadcast %367 : vector<8x1xf32> to vector<8x16xf32>
    %369 = arith.mulf %368, %22 : vector<8x16xf32>
    %370 = vector.extract_strided_slice %366 {offsets = [0, 1], sizes = [8, 1], strides = [1, 1]} : vector<8x4xf32> to vector<8x1xf32>
    %371 = vector.broadcast %370 : vector<8x1xf32> to vector<8x16xf32>
    %372 = arith.mulf %371, %25 : vector<8x16xf32>
    %373 = arith.addf %369, %372 : vector<8x16xf32>
    %374 = vector.extract_strided_slice %366 {offsets = [0, 2], sizes = [8, 1], strides = [1, 1]} : vector<8x4xf32> to vector<8x1xf32>
    %375 = vector.broadcast %374 : vector<8x1xf32> to vector<8x16xf32>
    %376 = arith.mulf %375, %28 : vector<8x16xf32>
    %377 = arith.addf %373, %376 : vector<8x16xf32>
    %378 = vector.extract_strided_slice %366 {offsets = [0, 3], sizes = [8, 1], strides = [1, 1]} : vector<8x4xf32> to vector<8x1xf32>
    %379 = vector.broadcast %378 : vector<8x1xf32> to vector<8x16xf32>
    %380 = arith.mulf %379, %31 : vector<8x16xf32>
    %381 = arith.addf %377, %380 : vector<8x16xf32>
    %382 = vector.extract_strided_slice %333 {offsets = [0, 0], sizes = [8, 1], strides = [1, 1]} : vector<8x4xf32> to vector<8x1xf32>
    %383 = vector.broadcast %382 : vector<8x1xf32> to vector<8x16xf32>
    %384 = arith.mulf %383, %34 : vector<8x16xf32>
    %385 = vector.extract_strided_slice %333 {offsets = [0, 1], sizes = [8, 1], strides = [1, 1]} : vector<8x4xf32> to vector<8x1xf32>
    %386 = vector.broadcast %385 : vector<8x1xf32> to vector<8x16xf32>
    %387 = arith.mulf %386, %37 : vector<8x16xf32>
    %388 = arith.addf %384, %387 : vector<8x16xf32>
    %389 = vector.extract_strided_slice %333 {offsets = [0, 2], sizes = [8, 1], strides = [1, 1]} : vector<8x4xf32> to vector<8x1xf32>
    %390 = vector.broadcast %389 : vector<8x1xf32> to vector<8x16xf32>
    %391 = arith.mulf %390, %40 : vector<8x16xf32>
    %392 = arith.addf %388, %391 : vector<8x16xf32>
    %393 = vector.extract_strided_slice %333 {offsets = [0, 3], sizes = [8, 1], strides = [1, 1]} : vector<8x4xf32> to vector<8x1xf32>
    %394 = vector.broadcast %393 : vector<8x1xf32> to vector<8x16xf32>
    %395 = arith.mulf %394, %43 : vector<8x16xf32>
    %396 = arith.addf %392, %395 : vector<8x16xf32>
    %397 = arith.addf %381, %396 : vector<8x16xf32>
    %398 = arith.addf %397, %45 : vector<8x16xf32>
    %399 = math.tanh %398 : vector<8x16xf32>
    %400 = vector.extract_strided_slice %399 {offsets = [0, 0], sizes = [8, 12], strides = [1, 1]} : vector<8x16xf32> to vector<8x12xf32>
    %cst_23 = arith.constant 5.000000e-01 : f32
    %401 = vector.broadcast %cst_23 : f32 to vector<8x12xf32>
    %402 = arith.mulf %401, %400 : vector<8x12xf32>
    %cst_24 = arith.constant 5.000000e-01 : f32
    %403 = vector.broadcast %cst_24 : f32 to vector<8x12xf32>
    %404 = arith.addf %402, %403 : vector<8x12xf32>
    %405 = vector.extract_strided_slice %404 {offsets = [0, 0], sizes = [8, 4], strides = [1, 1]} : vector<8x12xf32> to vector<8x4xf32>
    %406 = vector.extract_strided_slice %404 {offsets = [0, 4], sizes = [8, 4], strides = [1, 1]} : vector<8x12xf32> to vector<8x4xf32>
    %407 = vector.extract_strided_slice %404 {offsets = [0, 8], sizes = [8, 4], strides = [1, 1]} : vector<8x12xf32> to vector<8x4xf32>
    %408 = vector.extract_strided_slice %399 {offsets = [0, 12], sizes = [8, 4], strides = [1, 1]} : vector<8x16xf32> to vector<8x4xf32>
    %409 = arith.mulf %405, %331 : vector<8x4xf32>
    %410 = arith.mulf %407, %408 : vector<8x4xf32>
    %411 = arith.addf %409, %410 : vector<8x4xf32>
    %412 = math.tanh %411 : vector<8x4xf32>
    %413 = arith.mulf %406, %412 : vector<8x4xf32>
    %414 = vector.extract_strided_slice %51 {offsets = [5, 0, 0], sizes = [1, 8, 16], strides = [1, 1, 1]} : vector<8x8x16xf32> to vector<1x8x16xf32>
    %415 = vector.shape_cast %414 : vector<1x8x16xf32> to vector<8x16xf32>
    %416 = vector.extract_strided_slice %366 {offsets = [0, 0], sizes = [8, 1], strides = [1, 1]} : vector<8x4xf32> to vector<8x1xf32>
    %417 = vector.broadcast %416 : vector<8x1xf32> to vector<8x16xf32>
    %418 = arith.mulf %417, %10 : vector<8x16xf32>
    %419 = vector.extract_strided_slice %366 {offsets = [0, 1], sizes = [8, 1], strides = [1, 1]} : vector<8x4xf32> to vector<8x1xf32>
    %420 = vector.broadcast %419 : vector<8x1xf32> to vector<8x16xf32>
    %421 = arith.mulf %420, %13 : vector<8x16xf32>
    %422 = arith.addf %418, %421 : vector<8x16xf32>
    %423 = vector.extract_strided_slice %366 {offsets = [0, 2], sizes = [8, 1], strides = [1, 1]} : vector<8x4xf32> to vector<8x1xf32>
    %424 = vector.broadcast %423 : vector<8x1xf32> to vector<8x16xf32>
    %425 = arith.mulf %424, %16 : vector<8x16xf32>
    %426 = arith.addf %422, %425 : vector<8x16xf32>
    %427 = vector.extract_strided_slice %366 {offsets = [0, 3], sizes = [8, 1], strides = [1, 1]} : vector<8x4xf32> to vector<8x1xf32>
    %428 = vector.broadcast %427 : vector<8x1xf32> to vector<8x16xf32>
    %429 = arith.mulf %428, %19 : vector<8x16xf32>
    %430 = arith.addf %426, %429 : vector<8x16xf32>
    %431 = arith.addf %415, %430 : vector<8x16xf32>
    %432 = math.tanh %431 : vector<8x16xf32>
    %433 = vector.extract_strided_slice %432 {offsets = [0, 0], sizes = [8, 12], strides = [1, 1]} : vector<8x16xf32> to vector<8x12xf32>
    %cst_25 = arith.constant 5.000000e-01 : f32
    %434 = vector.broadcast %cst_25 : f32 to vector<8x12xf32>
    %435 = arith.mulf %434, %433 : vector<8x12xf32>
    %cst_26 = arith.constant 5.000000e-01 : f32
    %436 = vector.broadcast %cst_26 : f32 to vector<8x12xf32>
    %437 = arith.addf %435, %436 : vector<8x12xf32>
    %438 = vector.extract_strided_slice %437 {offsets = [0, 0], sizes = [8, 4], strides = [1, 1]} : vector<8x12xf32> to vector<8x4xf32>
    %439 = vector.extract_strided_slice %437 {offsets = [0, 4], sizes = [8, 4], strides = [1, 1]} : vector<8x12xf32> to vector<8x4xf32>
    %440 = vector.extract_strided_slice %437 {offsets = [0, 8], sizes = [8, 4], strides = [1, 1]} : vector<8x12xf32> to vector<8x4xf32>
    %441 = vector.extract_strided_slice %432 {offsets = [0, 12], sizes = [8, 4], strides = [1, 1]} : vector<8x16xf32> to vector<8x4xf32>
    %442 = arith.mulf %438, %364 : vector<8x4xf32>
    %443 = arith.mulf %440, %441 : vector<8x4xf32>
    %444 = arith.addf %442, %443 : vector<8x4xf32>
    %445 = math.tanh %444 : vector<8x4xf32>
    %446 = arith.mulf %439, %445 : vector<8x4xf32>
    %447 = vector.extract_strided_slice %446 {offsets = [0, 0], sizes = [8, 1], strides = [1, 1]} : vector<8x4xf32> to vector<8x1xf32>
    %448 = vector.broadcast %447 : vector<8x1xf32> to vector<8x16xf32>
    %449 = arith.mulf %448, %22 : vector<8x16xf32>
    %450 = vector.extract_strided_slice %446 {offsets = [0, 1], sizes = [8, 1], strides = [1, 1]} : vector<8x4xf32> to vector<8x1xf32>
    %451 = vector.broadcast %450 : vector<8x1xf32> to vector<8x16xf32>
    %452 = arith.mulf %451, %25 : vector<8x16xf32>
    %453 = arith.addf %449, %452 : vector<8x16xf32>
    %454 = vector.extract_strided_slice %446 {offsets = [0, 2], sizes = [8, 1], strides = [1, 1]} : vector<8x4xf32> to vector<8x1xf32>
    %455 = vector.broadcast %454 : vector<8x1xf32> to vector<8x16xf32>
    %456 = arith.mulf %455, %28 : vector<8x16xf32>
    %457 = arith.addf %453, %456 : vector<8x16xf32>
    %458 = vector.extract_strided_slice %446 {offsets = [0, 3], sizes = [8, 1], strides = [1, 1]} : vector<8x4xf32> to vector<8x1xf32>
    %459 = vector.broadcast %458 : vector<8x1xf32> to vector<8x16xf32>
    %460 = arith.mulf %459, %31 : vector<8x16xf32>
    %461 = arith.addf %457, %460 : vector<8x16xf32>
    %462 = vector.extract_strided_slice %413 {offsets = [0, 0], sizes = [8, 1], strides = [1, 1]} : vector<8x4xf32> to vector<8x1xf32>
    %463 = vector.broadcast %462 : vector<8x1xf32> to vector<8x16xf32>
    %464 = arith.mulf %463, %34 : vector<8x16xf32>
    %465 = vector.extract_strided_slice %413 {offsets = [0, 1], sizes = [8, 1], strides = [1, 1]} : vector<8x4xf32> to vector<8x1xf32>
    %466 = vector.broadcast %465 : vector<8x1xf32> to vector<8x16xf32>
    %467 = arith.mulf %466, %37 : vector<8x16xf32>
    %468 = arith.addf %464, %467 : vector<8x16xf32>
    %469 = vector.extract_strided_slice %413 {offsets = [0, 2], sizes = [8, 1], strides = [1, 1]} : vector<8x4xf32> to vector<8x1xf32>
    %470 = vector.broadcast %469 : vector<8x1xf32> to vector<8x16xf32>
    %471 = arith.mulf %470, %40 : vector<8x16xf32>
    %472 = arith.addf %468, %471 : vector<8x16xf32>
    %473 = vector.extract_strided_slice %413 {offsets = [0, 3], sizes = [8, 1], strides = [1, 1]} : vector<8x4xf32> to vector<8x1xf32>
    %474 = vector.broadcast %473 : vector<8x1xf32> to vector<8x16xf32>
    %475 = arith.mulf %474, %43 : vector<8x16xf32>
    %476 = arith.addf %472, %475 : vector<8x16xf32>
    %477 = arith.addf %461, %476 : vector<8x16xf32>
    %478 = arith.addf %477, %45 : vector<8x16xf32>
    %479 = math.tanh %478 : vector<8x16xf32>
    %480 = vector.extract_strided_slice %479 {offsets = [0, 0], sizes = [8, 12], strides = [1, 1]} : vector<8x16xf32> to vector<8x12xf32>
    %cst_27 = arith.constant 5.000000e-01 : f32
    %481 = vector.broadcast %cst_27 : f32 to vector<8x12xf32>
    %482 = arith.mulf %481, %480 : vector<8x12xf32>
    %cst_28 = arith.constant 5.000000e-01 : f32
    %483 = vector.broadcast %cst_28 : f32 to vector<8x12xf32>
    %484 = arith.addf %482, %483 : vector<8x12xf32>
    %485 = vector.extract_strided_slice %484 {offsets = [0, 0], sizes = [8, 4], strides = [1, 1]} : vector<8x12xf32> to vector<8x4xf32>
    %486 = vector.extract_strided_slice %484 {offsets = [0, 4], sizes = [8, 4], strides = [1, 1]} : vector<8x12xf32> to vector<8x4xf32>
    %487 = vector.extract_strided_slice %484 {offsets = [0, 8], sizes = [8, 4], strides = [1, 1]} : vector<8x12xf32> to vector<8x4xf32>
    %488 = vector.extract_strided_slice %479 {offsets = [0, 12], sizes = [8, 4], strides = [1, 1]} : vector<8x16xf32> to vector<8x4xf32>
    %489 = arith.mulf %485, %411 : vector<8x4xf32>
    %490 = arith.mulf %487, %488 : vector<8x4xf32>
    %491 = arith.addf %489, %490 : vector<8x4xf32>
    %492 = math.tanh %491 : vector<8x4xf32>
    %493 = arith.mulf %486, %492 : vector<8x4xf32>
    %494 = vector.extract_strided_slice %51 {offsets = [6, 0, 0], sizes = [1, 8, 16], strides = [1, 1, 1]} : vector<8x8x16xf32> to vector<1x8x16xf32>
    %495 = vector.shape_cast %494 : vector<1x8x16xf32> to vector<8x16xf32>
    %496 = vector.extract_strided_slice %446 {offsets = [0, 0], sizes = [8, 1], strides = [1, 1]} : vector<8x4xf32> to vector<8x1xf32>
    %497 = vector.broadcast %496 : vector<8x1xf32> to vector<8x16xf32>
    %498 = arith.mulf %497, %10 : vector<8x16xf32>
    %499 = vector.extract_strided_slice %446 {offsets = [0, 1], sizes = [8, 1], strides = [1, 1]} : vector<8x4xf32> to vector<8x1xf32>
    %500 = vector.broadcast %499 : vector<8x1xf32> to vector<8x16xf32>
    %501 = arith.mulf %500, %13 : vector<8x16xf32>
    %502 = arith.addf %498, %501 : vector<8x16xf32>
    %503 = vector.extract_strided_slice %446 {offsets = [0, 2], sizes = [8, 1], strides = [1, 1]} : vector<8x4xf32> to vector<8x1xf32>
    %504 = vector.broadcast %503 : vector<8x1xf32> to vector<8x16xf32>
    %505 = arith.mulf %504, %16 : vector<8x16xf32>
    %506 = arith.addf %502, %505 : vector<8x16xf32>
    %507 = vector.extract_strided_slice %446 {offsets = [0, 3], sizes = [8, 1], strides = [1, 1]} : vector<8x4xf32> to vector<8x1xf32>
    %508 = vector.broadcast %507 : vector<8x1xf32> to vector<8x16xf32>
    %509 = arith.mulf %508, %19 : vector<8x16xf32>
    %510 = arith.addf %506, %509 : vector<8x16xf32>
    %511 = arith.addf %495, %510 : vector<8x16xf32>
    %512 = math.tanh %511 : vector<8x16xf32>
    %513 = vector.extract_strided_slice %512 {offsets = [0, 0], sizes = [8, 12], strides = [1, 1]} : vector<8x16xf32> to vector<8x12xf32>
    %cst_29 = arith.constant 5.000000e-01 : f32
    %514 = vector.broadcast %cst_29 : f32 to vector<8x12xf32>
    %515 = arith.mulf %514, %513 : vector<8x12xf32>
    %cst_30 = arith.constant 5.000000e-01 : f32
    %516 = vector.broadcast %cst_30 : f32 to vector<8x12xf32>
    %517 = arith.addf %515, %516 : vector<8x12xf32>
    %518 = vector.extract_strided_slice %517 {offsets = [0, 0], sizes = [8, 4], strides = [1, 1]} : vector<8x12xf32> to vector<8x4xf32>
    %519 = vector.extract_strided_slice %517 {offsets = [0, 4], sizes = [8, 4], strides = [1, 1]} : vector<8x12xf32> to vector<8x4xf32>
    %520 = vector.extract_strided_slice %517 {offsets = [0, 8], sizes = [8, 4], strides = [1, 1]} : vector<8x12xf32> to vector<8x4xf32>
    %521 = vector.extract_strided_slice %512 {offsets = [0, 12], sizes = [8, 4], strides = [1, 1]} : vector<8x16xf32> to vector<8x4xf32>
    %522 = arith.mulf %518, %444 : vector<8x4xf32>
    %523 = arith.mulf %520, %521 : vector<8x4xf32>
    %524 = arith.addf %522, %523 : vector<8x4xf32>
    %525 = math.tanh %524 : vector<8x4xf32>
    %526 = arith.mulf %519, %525 : vector<8x4xf32>
    %527 = vector.extract_strided_slice %526 {offsets = [0, 0], sizes = [8, 1], strides = [1, 1]} : vector<8x4xf32> to vector<8x1xf32>
    %528 = vector.broadcast %527 : vector<8x1xf32> to vector<8x16xf32>
    %529 = arith.mulf %528, %22 : vector<8x16xf32>
    %530 = vector.extract_strided_slice %526 {offsets = [0, 1], sizes = [8, 1], strides = [1, 1]} : vector<8x4xf32> to vector<8x1xf32>
    %531 = vector.broadcast %530 : vector<8x1xf32> to vector<8x16xf32>
    %532 = arith.mulf %531, %25 : vector<8x16xf32>
    %533 = arith.addf %529, %532 : vector<8x16xf32>
    %534 = vector.extract_strided_slice %526 {offsets = [0, 2], sizes = [8, 1], strides = [1, 1]} : vector<8x4xf32> to vector<8x1xf32>
    %535 = vector.broadcast %534 : vector<8x1xf32> to vector<8x16xf32>
    %536 = arith.mulf %535, %28 : vector<8x16xf32>
    %537 = arith.addf %533, %536 : vector<8x16xf32>
    %538 = vector.extract_strided_slice %526 {offsets = [0, 3], sizes = [8, 1], strides = [1, 1]} : vector<8x4xf32> to vector<8x1xf32>
    %539 = vector.broadcast %538 : vector<8x1xf32> to vector<8x16xf32>
    %540 = arith.mulf %539, %31 : vector<8x16xf32>
    %541 = arith.addf %537, %540 : vector<8x16xf32>
    %542 = vector.extract_strided_slice %493 {offsets = [0, 0], sizes = [8, 1], strides = [1, 1]} : vector<8x4xf32> to vector<8x1xf32>
    %543 = vector.broadcast %542 : vector<8x1xf32> to vector<8x16xf32>
    %544 = arith.mulf %543, %34 : vector<8x16xf32>
    %545 = vector.extract_strided_slice %493 {offsets = [0, 1], sizes = [8, 1], strides = [1, 1]} : vector<8x4xf32> to vector<8x1xf32>
    %546 = vector.broadcast %545 : vector<8x1xf32> to vector<8x16xf32>
    %547 = arith.mulf %546, %37 : vector<8x16xf32>
    %548 = arith.addf %544, %547 : vector<8x16xf32>
    %549 = vector.extract_strided_slice %493 {offsets = [0, 2], sizes = [8, 1], strides = [1, 1]} : vector<8x4xf32> to vector<8x1xf32>
    %550 = vector.broadcast %549 : vector<8x1xf32> to vector<8x16xf32>
    %551 = arith.mulf %550, %40 : vector<8x16xf32>
    %552 = arith.addf %548, %551 : vector<8x16xf32>
    %553 = vector.extract_strided_slice %493 {offsets = [0, 3], sizes = [8, 1], strides = [1, 1]} : vector<8x4xf32> to vector<8x1xf32>
    %554 = vector.broadcast %553 : vector<8x1xf32> to vector<8x16xf32>
    %555 = arith.mulf %554, %43 : vector<8x16xf32>
    %556 = arith.addf %552, %555 : vector<8x16xf32>
    %557 = arith.addf %541, %556 : vector<8x16xf32>
    %558 = arith.addf %557, %45 : vector<8x16xf32>
    %559 = math.tanh %558 : vector<8x16xf32>
    %560 = vector.extract_strided_slice %559 {offsets = [0, 0], sizes = [8, 12], strides = [1, 1]} : vector<8x16xf32> to vector<8x12xf32>
    %cst_31 = arith.constant 5.000000e-01 : f32
    %561 = vector.broadcast %cst_31 : f32 to vector<8x12xf32>
    %562 = arith.mulf %561, %560 : vector<8x12xf32>
    %cst_32 = arith.constant 5.000000e-01 : f32
    %563 = vector.broadcast %cst_32 : f32 to vector<8x12xf32>
    %564 = arith.addf %562, %563 : vector<8x12xf32>
    %565 = vector.extract_strided_slice %564 {offsets = [0, 0], sizes = [8, 4], strides = [1, 1]} : vector<8x12xf32> to vector<8x4xf32>
    %566 = vector.extract_strided_slice %564 {offsets = [0, 4], sizes = [8, 4], strides = [1, 1]} : vector<8x12xf32> to vector<8x4xf32>
    %567 = vector.extract_strided_slice %564 {offsets = [0, 8], sizes = [8, 4], strides = [1, 1]} : vector<8x12xf32> to vector<8x4xf32>
    %568 = vector.extract_strided_slice %559 {offsets = [0, 12], sizes = [8, 4], strides = [1, 1]} : vector<8x16xf32> to vector<8x4xf32>
    %569 = arith.mulf %565, %491 : vector<8x4xf32>
    %570 = arith.mulf %567, %568 : vector<8x4xf32>
    %571 = arith.addf %569, %570 : vector<8x4xf32>
    %572 = math.tanh %571 : vector<8x4xf32>
    %573 = arith.mulf %566, %572 : vector<8x4xf32>
    %574 = vector.extract_strided_slice %51 {offsets = [7, 0, 0], sizes = [1, 8, 16], strides = [1, 1, 1]} : vector<8x8x16xf32> to vector<1x8x16xf32>
    %575 = vector.shape_cast %574 : vector<1x8x16xf32> to vector<8x16xf32>
    %576 = vector.extract_strided_slice %526 {offsets = [0, 0], sizes = [8, 1], strides = [1, 1]} : vector<8x4xf32> to vector<8x1xf32>
    %577 = vector.broadcast %576 : vector<8x1xf32> to vector<8x16xf32>
    %578 = arith.mulf %577, %10 : vector<8x16xf32>
    %579 = vector.extract_strided_slice %526 {offsets = [0, 1], sizes = [8, 1], strides = [1, 1]} : vector<8x4xf32> to vector<8x1xf32>
    %580 = vector.broadcast %579 : vector<8x1xf32> to vector<8x16xf32>
    %581 = arith.mulf %580, %13 : vector<8x16xf32>
    %582 = arith.addf %578, %581 : vector<8x16xf32>
    %583 = vector.extract_strided_slice %526 {offsets = [0, 2], sizes = [8, 1], strides = [1, 1]} : vector<8x4xf32> to vector<8x1xf32>
    %584 = vector.broadcast %583 : vector<8x1xf32> to vector<8x16xf32>
    %585 = arith.mulf %584, %16 : vector<8x16xf32>
    %586 = arith.addf %582, %585 : vector<8x16xf32>
    %587 = vector.extract_strided_slice %526 {offsets = [0, 3], sizes = [8, 1], strides = [1, 1]} : vector<8x4xf32> to vector<8x1xf32>
    %588 = vector.broadcast %587 : vector<8x1xf32> to vector<8x16xf32>
    %589 = arith.mulf %588, %19 : vector<8x16xf32>
    %590 = arith.addf %586, %589 : vector<8x16xf32>
    %591 = arith.addf %575, %590 : vector<8x16xf32>
    %592 = math.tanh %591 : vector<8x16xf32>
    %593 = vector.extract_strided_slice %592 {offsets = [0, 0], sizes = [8, 12], strides = [1, 1]} : vector<8x16xf32> to vector<8x12xf32>
    %cst_33 = arith.constant 5.000000e-01 : f32
    %594 = vector.broadcast %cst_33 : f32 to vector<8x12xf32>
    %595 = arith.mulf %594, %593 : vector<8x12xf32>
    %cst_34 = arith.constant 5.000000e-01 : f32
    %596 = vector.broadcast %cst_34 : f32 to vector<8x12xf32>
    %597 = arith.addf %595, %596 : vector<8x12xf32>
    %598 = vector.extract_strided_slice %597 {offsets = [0, 0], sizes = [8, 4], strides = [1, 1]} : vector<8x12xf32> to vector<8x4xf32>
    %599 = vector.extract_strided_slice %597 {offsets = [0, 4], sizes = [8, 4], strides = [1, 1]} : vector<8x12xf32> to vector<8x4xf32>
    %600 = vector.extract_strided_slice %597 {offsets = [0, 8], sizes = [8, 4], strides = [1, 1]} : vector<8x12xf32> to vector<8x4xf32>
    %601 = vector.extract_strided_slice %592 {offsets = [0, 12], sizes = [8, 4], strides = [1, 1]} : vector<8x16xf32> to vector<8x4xf32>
    %602 = arith.mulf %598, %524 : vector<8x4xf32>
    %603 = arith.mulf %600, %601 : vector<8x4xf32>
    %604 = arith.addf %602, %603 : vector<8x4xf32>
    %605 = math.tanh %604 : vector<8x4xf32>
    %606 = arith.mulf %599, %605 : vector<8x4xf32>
    %607 = vector.extract_strided_slice %606 {offsets = [0, 0], sizes = [8, 1], strides = [1, 1]} : vector<8x4xf32> to vector<8x1xf32>
    %608 = vector.broadcast %607 : vector<8x1xf32> to vector<8x16xf32>
    %609 = arith.mulf %608, %22 : vector<8x16xf32>
    %610 = vector.extract_strided_slice %606 {offsets = [0, 1], sizes = [8, 1], strides = [1, 1]} : vector<8x4xf32> to vector<8x1xf32>
    %611 = vector.broadcast %610 : vector<8x1xf32> to vector<8x16xf32>
    %612 = arith.mulf %611, %25 : vector<8x16xf32>
    %613 = arith.addf %609, %612 : vector<8x16xf32>
    %614 = vector.extract_strided_slice %606 {offsets = [0, 2], sizes = [8, 1], strides = [1, 1]} : vector<8x4xf32> to vector<8x1xf32>
    %615 = vector.broadcast %614 : vector<8x1xf32> to vector<8x16xf32>
    %616 = arith.mulf %615, %28 : vector<8x16xf32>
    %617 = arith.addf %613, %616 : vector<8x16xf32>
    %618 = vector.extract_strided_slice %606 {offsets = [0, 3], sizes = [8, 1], strides = [1, 1]} : vector<8x4xf32> to vector<8x1xf32>
    %619 = vector.broadcast %618 : vector<8x1xf32> to vector<8x16xf32>
    %620 = arith.mulf %619, %31 : vector<8x16xf32>
    %621 = arith.addf %617, %620 : vector<8x16xf32>
    %622 = vector.extract_strided_slice %573 {offsets = [0, 0], sizes = [8, 1], strides = [1, 1]} : vector<8x4xf32> to vector<8x1xf32>
    %623 = vector.broadcast %622 : vector<8x1xf32> to vector<8x16xf32>
    %624 = arith.mulf %623, %34 : vector<8x16xf32>
    %625 = vector.extract_strided_slice %573 {offsets = [0, 1], sizes = [8, 1], strides = [1, 1]} : vector<8x4xf32> to vector<8x1xf32>
    %626 = vector.broadcast %625 : vector<8x1xf32> to vector<8x16xf32>
    %627 = arith.mulf %626, %37 : vector<8x16xf32>
    %628 = arith.addf %624, %627 : vector<8x16xf32>
    %629 = vector.extract_strided_slice %573 {offsets = [0, 2], sizes = [8, 1], strides = [1, 1]} : vector<8x4xf32> to vector<8x1xf32>
    %630 = vector.broadcast %629 : vector<8x1xf32> to vector<8x16xf32>
    %631 = arith.mulf %630, %40 : vector<8x16xf32>
    %632 = arith.addf %628, %631 : vector<8x16xf32>
    %633 = vector.extract_strided_slice %573 {offsets = [0, 3], sizes = [8, 1], strides = [1, 1]} : vector<8x4xf32> to vector<8x1xf32>
    %634 = vector.broadcast %633 : vector<8x1xf32> to vector<8x16xf32>
    %635 = arith.mulf %634, %43 : vector<8x16xf32>
    %636 = arith.addf %632, %635 : vector<8x16xf32>
    %637 = arith.addf %621, %636 : vector<8x16xf32>
    %638 = arith.addf %637, %45 : vector<8x16xf32>
    %639 = math.tanh %638 : vector<8x16xf32>
    %640 = vector.extract_strided_slice %639 {offsets = [0, 0], sizes = [8, 12], strides = [1, 1]} : vector<8x16xf32> to vector<8x12xf32>
    %cst_35 = arith.constant 5.000000e-01 : f32
    %641 = vector.broadcast %cst_35 : f32 to vector<8x12xf32>
    %642 = arith.mulf %641, %640 : vector<8x12xf32>
    %cst_36 = arith.constant 5.000000e-01 : f32
    %643 = vector.broadcast %cst_36 : f32 to vector<8x12xf32>
    %644 = arith.addf %642, %643 : vector<8x12xf32>
    %645 = vector.extract_strided_slice %644 {offsets = [0, 0], sizes = [8, 4], strides = [1, 1]} : vector<8x12xf32> to vector<8x4xf32>
    %646 = vector.extract_strided_slice %644 {offsets = [0, 4], sizes = [8, 4], strides = [1, 1]} : vector<8x12xf32> to vector<8x4xf32>
    %647 = vector.extract_strided_slice %644 {offsets = [0, 8], sizes = [8, 4], strides = [1, 1]} : vector<8x12xf32> to vector<8x4xf32>
    %648 = vector.extract_strided_slice %639 {offsets = [0, 12], sizes = [8, 4], strides = [1, 1]} : vector<8x16xf32> to vector<8x4xf32>
    %649 = arith.mulf %645, %571 : vector<8x4xf32>
    %650 = arith.mulf %647, %648 : vector<8x4xf32>
    %651 = arith.addf %649, %650 : vector<8x4xf32>
    %652 = math.tanh %651 : vector<8x4xf32>
    %653 = arith.mulf %646, %652 : vector<8x4xf32>
    %654 = vector.shape_cast %93 : vector<8x4xf32> to vector<1x8x4xf32>
    %655 = vector.shape_cast %173 : vector<8x4xf32> to vector<1x8x4xf32>
    %656 = vector.shape_cast %253 : vector<8x4xf32> to vector<1x8x4xf32>
    %657 = vector.shape_cast %333 : vector<8x4xf32> to vector<1x8x4xf32>
    %658 = vector.shape_cast %413 : vector<8x4xf32> to vector<1x8x4xf32>
    %659 = vector.shape_cast %493 : vector<8x4xf32> to vector<1x8x4xf32>
    %660 = vector.shape_cast %573 : vector<8x4xf32> to vector<1x8x4xf32>
    %661 = vector.shape_cast %653 : vector<8x4xf32> to vector<1x8x4xf32>
    %662 = tpu.concatenate %654, %655, %656, %657, %658, %659, %660, %661 in 0 : vector<1x8x4xf32>, vector<1x8x4xf32>, vector<1x8x4xf32>, vector<1x8x4xf32>, vector<1x8x4xf32>, vector<1x8x4xf32>, vector<1x8x4xf32>, vector<1x8x4xf32> -> vector<8x8x4xf32>
    %663 = vector.shape_cast %6 : vector<1x4xf32> to vector<1x1x4xf32>
    %664 = vector.broadcast %663 : vector<1x1x4xf32> to vector<8x8x4xf32>
    %665 = arith.mulf %662, %664 : vector<8x8x4xf32>
    %cst_37 = arith.constant dense<0.000000e+00> : vector<8x8xf32>
    %666 = vector.multi_reduction <add>, %665, %cst_37 [2] : vector<8x8x4xf32> to vector<8x8xf32>
    %667 = vector.broadcast %7 : vector<1x1xf32> to vector<8x8xf32>
    %668 = arith.addf %666, %667 : vector<8x8xf32>
    %c0_38 = arith.constant 0 : index
    %c0_39 = arith.constant 0 : index
    %669 = vector.load %arg3[%c0_38, %c0_39] : memref<8x8xf32, #tpu.memory_space<vmem>>, vector<8x8xf32>
    tpu.vector_store %arg3[%c0_38, %c0_39], %668 {strides = array<i32>} : memref<8x8xf32, #tpu.memory_space<vmem>>, vector<8x8xf32>,
    return
  }
}

</mosaic_0001>

<bundles_post_ra>
// kernel: tpu_custom_call.1
= control target key start
LH: loop header
LB: loop body
LE: loop exit
PB: predicated region body
PF: predicated region fallthrough
CT: control target
= control target key end

     0   :  { %vm116_vm0 = vcmask 1040384   ;;  %vm91_vm1 = vcmask 596992   ;;  %s1863_s0 = inlined_call_operand.vmem [shape: f32[64,73], index: 0, kind: input, shape index: {}]   ;;  %s1864_s1 = inlined_call_operand.vmem [shape: f32[73,16], index: 1, kind: input, shape index: {}]   ;;  %s1865_s2 = inlined_call_operand.vmem [shape: f32[16,16], index: 2, kind: input, shape index: {}]   ;;  %s1866_s3 = inlined_call_operand.hbm [shape: f32[8,8], index: 3, kind: output, shape index: {}]  }
   0x1   :  { %v86_v0 = vld [vmem:[%s1864_s1 + $0x48] sm:$0x1]  ;;  %v85_v1 = vld [vmem:[%s1864_s1 + $0x40] sm:$0xff]  ;;  %v84_v2 = vld [vmem:[%s1864_s1 + $0x38] sm:$0xff] }
   0x2   :  { %1158 = vmatprep.subr.msk.mxu0 %vm116_vm0, %v86_v0  ;;  %1190 = vmatprep.subr.msk.mxu1 %vm116_vm0, %v86_v0  ;;  %v69_v3 = vld [vmem:[%s1863_s0] sm:$0xff]  ;;  %v83_v4 = vld [vmem:[%s1864_s1 + $0x30] sm:$0xff] }
   0x3   :  { %1159 = vmatpush3.msk.msra.mxu0 %vm116_vm0, %v86_v0  ;;  %1200 = vmatpush3.msk.msra.mxu1 %vm116_vm0, %v86_v0 }
   0x4   :  { %1160 = vmatprep.subr.mxu0 %v85_v1  ;;  %1191 = vmatprep.subr.mxu1 %v85_v1 }
   0x5   :  { %1161 = vmatpush3.msra.mxu0 %v85_v1  ;;  %1178 = vmatprep.mubr.msk.f32.mxu0 %vm91_vm1, %v69_v3 }
   0x6   :  { %8 = vsyncpa [#allocation3], 0  ;;  %1162 = vmatprep.subr.mxu0 %v84_v2  ;;  %1201 = vmatpush3.msra.mxu1 %v85_v1  ;;  %v82_v5 = vld [vmem:[%s1864_s1 + $0x28] sm:$0xff]  ;;  %v81_v6 = vld [vmem:[%s1864_s1 + $0x20] sm:$0xff]  ;;  %v17_v12 = vlaneseq  ;;  %s1364_s10 = smov 124   ;;  %v1365_v25 = vmov 6  }
   0x7   :  { %1163 = vmatpush3.msra.mxu0 %v84_v2  ;;  %1192 = vmatprep.subr.mxu1 %v84_v2  ;;  %v80_v7 = vld [vmem:[%s1864_s1 + $0x18] sm:$0xff]  ;;  %v79_v8 = vld [vmem:[%s1864_s1 + $0x10] sm:$0xff]  ;;  %v78_v9 = vld [vmem:[%s1864_s1 + $0x8] sm:$0xff]  ;;  %v1366_v26 = vmov 4   ;;  %s1367_s11 = smov 120   ;;  %v1368_v30 = vmov 5  }
   0x8   :  { %1164 = vmatprep.subr.mxu0 %v83_v4  ;;  %1202 = vmatpush3.msra.mxu1 %v84_v2  ;;  %v77_v10 = vld [vmem:[%s1864_s1] sm:$0xff]  ;;  %v70_v11 = vld [vmem:[%s1863_s0 + $0x8] sm:$0xff]  ;;  %v1431_v13 = vshrl.u32 %v17_v12, 7  ;;  %v1369_v31 = vmov 7   ;;  %s1370_s18 = smov 4   ;;  %vm1020_vm2 = vcmask 31744  }
   0x9   :  { %1165 = vmatpush3.msra.mxu0 %v83_v4  ;;  %1193 = vmatprep.subr.mxu1 %v83_v4  ;;  %v1437_v15 = vld [vmem:[%s1865_s2 + $0x8] sm:$0xff]  ;;  %v15_v35 = vld [vmem:[%s1865_s2] sm:$0xff]  ;;  %vm1100_vm3 = vcmask 1041409   ;;  %vm1102_vm4 = vcmask 1042434   ;;  %vm1104_vm5 = vcmask 1043459   ;;  %vm1106_vm6 = vcmask 1044484  }
   0xa   :  { %1166 = vmatprep.subr.mxu0 %v82_v5  ;;  %1203 = vmatpush3.msra.mxu1 %v83_v4  ;;  %v35_v14 = vsub.s32 4, %v1431_v13  ;;  %v19_v32 = vsub.s32 0, %v1431_v13  ;;  %v23_v33 = vsub.s32 1, %v1431_v13  ;;  %v39_v34 = vsub.s32 5, %v1431_v13  ;;  %s1371_s28 = smov [#allocation2]  }
   0xb   :  { %1167 = vmatpush3.msra.mxu0 %v82_v5  ;;  %1194 = vmatprep.subr.mxu1 %v82_v5  ;;  %v27_v36 = vsub.s32 2, %v1431_v13  ;;  %v43_v37 = vsub.s32 6, %v1431_v13  ;;  %v31_v43 = vsub.s32 3, %v1431_v13  ;;  %v47_v44 = vsub.s32 7, %v1431_v13  ;;  %s1123_s29 = sshll.u32 %s1371_s28, 4  ;;  %s1124_s29 = int_to_ptr.vmem [resolvable:$true] %s1123_s29 }
   0xc   :  { %1168 = vmatprep.subr.mxu0 %v81_v6  ;;  %1204 = vmatpush3.msra.mxu1 %v82_v5  ;;  %v1442_v17 = vrot.slane %v1437_v15, %v35_v14  ;;  %v1464_v39 = vrot.slane %v15_v35, %v19_v32  ;;  %v1466_v40 = vrot.slane %v15_v35, %v35_v14  ;;  %vm1108_vm7 = vcmask 1045509   ;;  %s1342_s30 = scalar_lea.vmem %s1124_s29, 128  ;;  %p1347_p1 = scmp.lt.s32.totalorder %s1124_s29, %s1124_s29 }
   0xd   :  { %1169 = vmatpush3.msra.mxu0 %v81_v6  ;;  %1195 = vmatprep.subr.mxu1 %v81_v6  ;;  %v1470_v41 = vrot.slane %v15_v35, %v23_v33  ;;  %v1472_v42 = vrot.slane %v15_v35, %v39_v34  ;;  %v1478_v45 = vrot.slane %v15_v35, %v27_v36  ;;  %vm1110_vm8 = vcmask 1046534   ;;  %p1343_p0 = scmp.ne.s32.totalorder %s1124_s29, %s1342_s30  ;;  %p1348_p2 = scmp.lt.s32.totalorder %s1342_s30, %s1342_s30 }
   0xe   :  { %1170 = vmatprep.subr.mxu0 %v80_v7  ;;  %1205 = vmatpush3.msra.mxu1 %v81_v6  ;;  %v1482_v46 = vrot.slane %v15_v35, %v43_v37  ;;  %v1490_v53 = vrot.slane %v15_v35, %v31_v43  ;;  %v1492_v54 = vrot.slane %v15_v35, %v47_v44  ;;  %vm1112_vm9 = vcmask 1047559  }
   0xf   :  { %1171 = vmatpush3.msra.mxu0 %v80_v7  ;;  %1196 = vmatprep.subr.mxu1 %v80_v7  ;;  %v1501_v2 = vrot.slane %v1437_v15, %v39_v34  ;;  %vm1115_vm10 = vcmask 64512   ;;  %p1349_p3 = por %p1348_p2, %p1347_p1 }
  0x10   :  { %1172 = vmatprep.subr.mxu0 %v79_v8  ;;  %1206 = vmatpush3.msra.mxu1 %v80_v7 }
  0x11   :  { %1173 = vmatpush3.msra.mxu0 %v79_v8  ;;  %1197 = vmatprep.subr.mxu1 %v79_v8  ;;  %p1350_p4 = pnand %p1349_p3, %p1343_p0 }
  0x12   :  { %1174 = vmatprep.subr.mxu0 %v78_v9  ;;  %1207 = vmatpush3.msra.mxu1 %v79_v8 }
  0x13   :  { %1175 = vmatpush3.msra.mxu0 %v78_v9  ;;  %1198 = vmatprep.subr.mxu1 %v78_v9 }
  0x14   :  { %1176 = vmatprep.subr.mxu0 %v77_v10  ;;  %1208 = vmatpush3.msra.mxu1 %v78_v9 }
  0x15   :  { %1177 = vmatpush3.msra.mxu0 %v77_v10  ;;  %1199 = vmatprep.subr.mxu1 %v77_v10 }
  0x16   :  { %1179 = vmatmul.mubr.msk.f32.vlgmr.msra.gmra.mxu0 %vm91_vm1, %v70_v11  ;;  %1209 = vmatpush3.msra.mxu1 %v77_v10 }
  0x17   :  { %1222 = vset.pattern.permute.xlu0 %v1365_v25  ;;  %1220 = vset.pattern.permute.xlu1 %v1366_v26 }
  0xd6   :  { %v1439_v16 = vpop.f32.mrf.mxu0 }
  0xd7   :  { %v192_v0 = vadd.f32 %v1439_v16, %v1442_v17 }
  0xd8   :  { %v186_v18 = vpop.f32.mrf.mxu0 }
  0xd9   :  { %v187_v19 = vadd.f32 %v186_v18, %v1442_v17 }
  0xdb   :  { %1277 = vtanh.f32 %v187_v19 }
  0xe8   :  { %v1278_v20 = vpop.eup %1277 }
  0xe9   :  { %229 = vrot.lane.b32.xlu0 %v1278_v20, %s1364_s10  ;;  %v226_v21 = vmul.f32 0.5, %v1278_v20 }
  0xeb   :  { %v227_v22 = vadd.f32 0.5, %v226_v21  ;;  %v71_v21 = vld [vmem:[%s1863_s0 + $0x10] sm:$0xff] }
  0xec   :  { %1181 = vmatprep.mubr.msk.f32.mxu0 %vm91_vm1, %v71_v21 }
 0x15b   :  { %v230_v23 = vpop.permute.xlu0 %229 }
 0x15c   :  { %v232_v24 = vmul.f32 %v230_v23, %v227_v22 }
 0x15e   :  { %1279 = vtanh.f32 %v232_v24 }
 0x16b   :  { %v1280_v27 = vpop.eup %1279 }
 0x16c   :  { %235 = vrot.lane.b32.xlu0 %v1280_v27, %s1364_s10 }
 0x1de   :  { %v236_v28 = vpop.permute.xlu0 %235 }
 0x1df   :  { %v238_v29 = vmul.f32 %v236_v28, %v227_v22  ;;  %v72_v22 = vld [vmem:[%s1863_s0 + $0x18] sm:$0xff] }
 0x1e0   :  { %1182 = vmatmul.mubr.msk.f32.gmra.mxu0 %vm91_vm1, %v72_v22 }
 0x1e1   :  { %252 = vperm.xlu0 %1222, %v238_v29   ;;  %241 = vperm.xlu1 %1220, %v238_v29  }
 0x1e5   :  { %290 = vrot.lane.b32.xlu0 %v232_v24, %s1367_s11  ;;  %1221 = vset.pattern.permute.xlu1 %v1368_v30 }
 0x1e6   :  { %246 = vperm.xlu1 %1221, %v238_v29   ;;  %1228 = vset.pattern.permute.xlu0 %v1368_v30 }
 0x1ea   :  { %1223 = vset.pattern.permute.xlu1 %v1369_v31 }
 0x1eb   :  { %258 = vperm.xlu1 %1223, %v238_v29  }
 0x1ef   :  { %1224 = vset.pattern.permute.xlu1 %v1366_v26 }
 0x25c   :  { %v242_v38 = vpop.permute.xlu1 %241  ;;  %v253_v47 = vpop.permute.xlu0 %252 }
 0x25d   :  { %v244_v49 = vmul.f32 %v242_v38, %v1466_v40  ;;  %v278_v50 = vmul.f32 %v242_v38, %v1464_v39  ;;  %v255_v55 = vmul.f32 %v253_v47, %v1482_v46  ;;  %v281_v56 = vmul.f32 %v253_v47, %v1478_v45 }
 0x260   :  { %v291_v23 = vpop.permute.xlu0 %290 }
 0x261   :  { %v247_v48 = vpop.permute.xlu1 %246 }
 0x262   :  { %v249_v51 = vmul.f32 %v247_v48, %v1472_v42  ;;  %v279_v52 = vmul.f32 %v247_v48, %v1470_v41 }
 0x264   :  { %v250_v57 = vadd.f32 %v249_v51, %v244_v49  ;;  %v280_v58 = vadd.f32 %v279_v52, %v278_v50  ;;  %v1538_v52 = vrot.slane %v1437_v15, %v23_v33 }
 0x266   :  { %v259_v59 = vpop.permute.xlu1 %258  ;;  %v256_v60 = vadd.f32 %v255_v55, %v250_v57  ;;  %v282_v61 = vadd.f32 %v281_v56, %v280_v58  ;;  %v1543_v55 = vrot.slane %v1437_v15, %v19_v32  ;;  %v1548_v56 = vrot.slane %v1437_v15, %v27_v36 }
 0x267   :  { %v261_v62 = vmul.f32 %v259_v59, %v1492_v54  ;;  %v283_v63 = vmul.f32 %v259_v59, %v1490_v53  ;;  %v1559_v32 = vrot.slane %v1437_v15, %v31_v43 }
 0x269   :  { %v284_v1 = vadd.f32 %v283_v63, %v282_v61  ;;  %v262_v3 = vadd.f32 %v261_v62, %v256_v60 }
 0x26b   :  { %v285_v4 = vadd.f32 %v284_v1, %v192_v0  ;;  %v263_v5 = vadd.f32 %v262_v3, %v1501_v2 }
 0x26d   :  { %1281 = vtanh.f32 %v285_v4 }
 0x26e   :  { %1283 = vtanh.f32 %v263_v5 }
 0x27a   :  { %v1282_v6 = vpop.eup %1281 }
 0x27b   :  { %295 = vrot.lane.b32.xlu1 %v1282_v6, %s1364_s10  ;;  %v1284_v7 = vpop.eup %1283  ;;  %v287_v8 = vmul.f32 0.5, %v1282_v6 }
 0x27c   :  { %v265_v10 = vmul.f32 0.5, %v1284_v7 }
 0x27d   :  { %v288_v9 = vadd.f32 0.5, %v287_v8 }
 0x27e   :  { %v266_v16 = vadd.f32 0.5, %v265_v10 }
 0x27f   :  { %268 = vrot.lane.b32.xlu1 %v1284_v7, %s1364_s10  ;;  %v293_v24 = vmul.f32 %v291_v23, %v288_v9 }
 0x2a0   :  { %v1564_v4 = vpop.f32.mrf.mxu0 }
 0x2a2   :  { %v196_v43 = vpop.f32.mrf.mxu0 }
 0x2ed   :  { %v296_v11 = vpop.permute.xlu1 %295 }
 0x2ee   :  { %v298_v14 = vmul.f32 %v296_v11, %v288_v9 }
 0x2f0   :  { %300 = vrot.lane.b32.xlu0 %v298_v14, %s1367_s11 }
 0x2f1   :  { %v269_v18 = vpop.permute.xlu1 %268 }
 0x2f2   :  { %v271_v19 = vmul.f32 %v269_v18, %v266_v16 }
 0x2f4   :  { %1285 = vtanh.f32 %v271_v19 }
 0x301   :  { %v1286_v20 = vpop.eup %1285 }
 0x302   :  { %274 = vrot.lane.b32.xlu1 %v1286_v20, %s1364_s10 }
 0x362   :  { %v301_v27 = vpop.permute.xlu0 %300 }
 0x363   :  { %v1516_v28 = vadd.f32 %v301_v27, %v293_v24 }
 0x365   :  { %1287 = vtanh.f32 %v1516_v28 }
 0x372   :  { %v1288_v29 = vpop.eup %1287 }
 0x373   :  { %306 = vrot.lane.b32.xlu0 %v1288_v29, %s1370_s18 }
 0x374   :  { %v275_v34 = vpop.permute.xlu1 %274 }
 0x375   :  { %v1520_v35 = vmul.f32 %v275_v34, %v266_v16 }
 0x377   :  { %336 = vperm.xlu1 %1224, %v1520_v35  }
 0x37b   :  { %1225 = vset.pattern.permute.xlu1 %v1368_v30 }
 0x37c   :  { %341 = vperm.xlu1 %1225, %v1520_v35  }
 0x380   :  { %1226 = vset.pattern.permute.xlu1 %v1365_v25 }
 0x381   :  { %347 = vperm.xlu1 %1226, %v1520_v35  }
 0x385   :  { %1227 = vset.pattern.permute.xlu1 %v1366_v26 }
 0x3e5   :  { %v307_v38 = vpop.permute.xlu0 %306 }
 0x3e6   :  { %v309_v44 = vmul.f32 %v307_v38, %v288_v9 }
 0x3e8   :  { %317 = vperm.xlu0 %1228, %v309_v44   ;;  %312 = vperm.xlu1 %1227, %v309_v44  }
 0x3ec   :  { %1229 = vset.pattern.permute.xlu0 %v1365_v25  ;;  %1230 = vset.pattern.permute.xlu1 %v1369_v31 }
 0x3ed   :  { %323 = vperm.xlu0 %1229, %v309_v44   ;;  %329 = vperm.xlu1 %1230, %v309_v44  }
 0x3f1   :  { %1231 = vset.pattern.permute.xlu0 %v1369_v31  ;;  %1232 = vset.pattern.permute.xlu1 %v1366_v26 }
 0x3f2   :  { %353 = vperm.xlu0 %1231, %v1520_v35   ;;  %v337_v47 = vpop.permute.xlu1 %336 }
 0x3f3   :  { %v339_v36 = vmul.f32 %v337_v47, %v1543_v55 }
 0x3f6   :  { %364 = vrot.lane.b32.xlu0 %v271_v19, %s1367_s11  ;;  %v197_v19 = vadd.f32 %v196_v43, %v1442_v17 }
 0x3f7   :  { %1233 = vset.pattern.permute.xlu0 %v1368_v30  ;;  %v342_v48 = vpop.permute.xlu1 %341 }
 0x3f8   :  { %v344_v59 = vmul.f32 %v342_v48, %v1538_v52 }
 0x3fa   :  { %v345_v5 = vadd.f32 %v344_v59, %v339_v36 }
 0x3fc   :  { %v348_v49 = vpop.permute.xlu1 %347 }
 0x3fd   :  { %v350_v63 = vmul.f32 %v348_v49, %v1548_v56 }
 0x3ff   :  { %v351_v9 = vadd.f32 %v350_v63, %v345_v5 }
 0x463   :  { %v318_v50 = vpop.permute.xlu0 %317  ;;  %v313_v51 = vpop.permute.xlu1 %312 }
 0x464   :  { %v320_v57 = vmul.f32 %v318_v50, %v1472_v42  ;;  %v315_v58 = vmul.f32 %v313_v51, %v1466_v40  ;;  %v385_v60 = vmul.f32 %v318_v50, %v1470_v41  ;;  %v384_v33 = vmul.f32 %v313_v51, %v1464_v39 }
 0x466   :  { %v321_v0 = vadd.f32 %v320_v57, %v315_v58  ;;  %v386_v6 = vadd.f32 %v385_v60, %v384_v33 }
 0x468   :  { %v324_v61 = vpop.permute.xlu0 %323  ;;  %v330_v3 = vpop.permute.xlu1 %329 }
 0x469   :  { %v326_v62 = vmul.f32 %v324_v61, %v1482_v46  ;;  %v387_v1 = vmul.f32 %v324_v61, %v1478_v45  ;;  %v332_v11 = vmul.f32 %v330_v3, %v1492_v54  ;;  %v389_v16 = vmul.f32 %v330_v3, %v1490_v53 }
 0x46b   :  { %v327_v7 = vadd.f32 %v326_v62, %v321_v0  ;;  %v388_v10 = vadd.f32 %v387_v1, %v386_v6 }
 0x46d   :  { %v354_v8 = vpop.permute.xlu0 %353  ;;  %v333_v14 = vadd.f32 %v332_v11, %v327_v7  ;;  %v390_v20 = vadd.f32 %v389_v16, %v388_v10 }
 0x46e   :  { %v356_v15 = vmul.f32 %v354_v8, %v1559_v32 }
 0x46f   :  { %v391_v23 = vadd.f32 %v390_v20, %v197_v19 }
 0x470   :  { %v357_v18 = vadd.f32 %v356_v15, %v351_v9 }
 0x471   :  { %v365_v51 = vpop.permute.xlu0 %364 }
 0x472   :  { %v358_v21 = vadd.f32 %v357_v18, %v333_v14 }
 0x474   :  { %v359_v22 = vadd.f32 %v358_v21, %v1501_v2 }
 0x476   :  { %1289 = vtanh.f32 %v359_v22 }
 0x477   :  { %1291 = vtanh.f32 %v391_v23 }
 0x483   :  { %v1290_v24 = vpop.eup %1289 }
 0x484   :  { %369 = vrot.lane.b32.xlu1 %v1290_v24, %s1364_s10  ;;  %v1292_v27 = vpop.eup %1291  ;;  %v361_v29 = vmul.f32 0.5, %v1290_v24 }
 0x485   :  { %v393_v38 = vmul.f32 0.5, %v1292_v27 }
 0x486   :  { %v362_v34 = vadd.f32 0.5, %v361_v29 }
 0x487   :  { %v394_v48 = vadd.f32 0.5, %v393_v38 }
 0x488   :  { %397 = vrot.lane.b32.xlu1 %v1292_v27, %s1364_s10  ;;  %v367_v57 = vmul.f32 %v365_v51, %v362_v34 }
 0x489   :  { %v395_v60 = vmul.f32 %v394_v48, %v1516_v28 }
 0x4f6   :  { %v370_v44 = vpop.permute.xlu1 %369 }
 0x4f7   :  { %v372_v47 = vmul.f32 %v370_v44, %v362_v34 }
 0x4f9   :  { %374 = vrot.lane.b32.xlu1 %v372_v47, %s1367_s11 }
 0x4fa   :  { %v398_v49 = vpop.permute.xlu1 %397 }
 0x4fb   :  { %v400_v50 = vmul.f32 %v398_v49, %v394_v48 }
 0x4fd   :  { %402 = vrot.lane.b32.xlu0 %v400_v50, %s1367_s11 }
 0x56b   :  { %v375_v58 = vpop.permute.xlu1 %374 }
 0x56c   :  { %v1575_v59 = vadd.f32 %v375_v58, %v367_v57  ;;  %v202_v58 = vadd.f32 %v1564_v4, %v1442_v17 }
 0x56e   :  { %1293 = vtanh.f32 %v1575_v59 }
 0x56f   :  { %v403_v33 = vpop.permute.xlu0 %402 }
 0x570   :  { %v1579_v61 = vadd.f32 %v403_v33, %v395_v60 }
 0x572   :  { %1295 = vtanh.f32 %v1579_v61 }
 0x57b   :  { %v1294_v62 = vpop.eup %1293 }
 0x57c   :  { %380 = vrot.lane.b32.xlu1 %v1294_v62, %s1370_s18 }
 0x57f   :  { %v1296_v36 = vpop.eup %1295 }
 0x580   :  { %408 = vrot.lane.b32.xlu0 %v1296_v36, %s1370_s18 }
 0x5ee   :  { %v381_v1 = vpop.permute.xlu1 %380 }
 0x5ef   :  { %v1584_v3 = vmul.f32 %v381_v1, %v362_v34 }
 0x5f2   :  { %v409_v63 = vpop.permute.xlu0 %408 }
 0x5f3   :  { %v411_v0 = vmul.f32 %v409_v63, %v394_v48 }
 0x5f5   :  { %419 = vperm.xlu0 %1233, %v411_v0   ;;  %414 = vperm.xlu1 %1232, %v411_v0  }
 0x5f9   :  { %1234 = vset.pattern.permute.xlu0 %v1365_v25  ;;  %438 = vperm.xlu1 %1232, %v1584_v3  }
 0x5fa   :  { %425 = vperm.xlu0 %1234, %v411_v0  }
 0x5fd   :  { %1235 = vset.pattern.permute.xlu1 %v1368_v30 }
 0x5fe   :  { %1238 = vset.pattern.permute.xlu0 %v1369_v31  ;;  %443 = vperm.xlu1 %1235, %v1584_v3  }
 0x5ff   :  { %455 = vperm.xlu0 %1238, %v1584_v3  }
 0x602   :  { %1236 = vset.pattern.permute.xlu1 %v1365_v25 }
 0x603   :  { %449 = vperm.xlu1 %1236, %v1584_v3   ;;  %1239 = vset.pattern.permute.xlu0 %v1366_v26 }
 0x607   :  { %1237 = vset.pattern.permute.xlu1 %v1369_v31 }
 0x608   :  { %431 = vperm.xlu1 %1237, %v411_v0  }
 0x60c   :  { %1240 = vset.pattern.permute.xlu1 %v1368_v30 }
 0x670   :  { %v415_v28 = vpop.permute.xlu1 %414  ;;  %v420_v6 = vpop.permute.xlu0 %419 }
 0x671   :  { %v422_v10 = vmul.f32 %v420_v6, %v1472_v42  ;;  %v417_v11 = vmul.f32 %v415_v28, %v1466_v40  ;;  %v483_v14 = vmul.f32 %v420_v6, %v1470_v41  ;;  %v482_v16 = vmul.f32 %v415_v28, %v1464_v39 }
 0x673   :  { %v423_v22 = vadd.f32 %v422_v10, %v417_v11  ;;  %v484_v27 = vadd.f32 %v483_v14, %v482_v16 }
 0x674   :  { %v439_v5 = vpop.permute.xlu1 %438 }
 0x675   :  { %v426_v8 = vpop.permute.xlu0 %425  ;;  %v441_v15 = vmul.f32 %v439_v5, %v1543_v55 }
 0x676   :  { %v428_v19 = vmul.f32 %v426_v8, %v1482_v46  ;;  %v485_v23 = vmul.f32 %v426_v8, %v1478_v45  ;;  %v73_v8 = vld [vmem:[%s1863_s0 + $0x20] sm:$0xff] }
 0x677   :  { %1184 = vmatprep.mubr.msk.f32.mxu1 %vm91_vm1, %v73_v8 }
 0x678   :  { %v429_v34 = vadd.f32 %v428_v19, %v423_v22  ;;  %v486_v48 = vadd.f32 %v485_v23, %v484_v27 }
 0x679   :  { %v444_v7 = vpop.permute.xlu1 %443 }
 0x67a   :  { %v446_v9 = vmul.f32 %v444_v7, %v1538_v52  ;;  %v456_v21 = vpop.permute.xlu0 %455 }
 0x67b   :  { %v458_v38 = vmul.f32 %v456_v21, %v1559_v32 }
 0x67c   :  { %v447_v20 = vadd.f32 %v446_v9, %v441_v15  ;;  %v74_v9 = vld [vmem:[%s1863_s0 + $0x28] sm:$0xff] }
 0x67d   :  { %1185 = vmatmul.mubr.msk.f32.vlgmr.msra.gmra.mxu1 %vm91_vm1, %v74_v9 }
 0x67e   :  { %v450_v43 = vpop.permute.xlu1 %449 }
 0x67f   :  { %v452_v18 = vmul.f32 %v450_v43, %v1548_v56 }
 0x681   :  { %v453_v24 = vadd.f32 %v452_v18, %v447_v20 }
 0x683   :  { %v432_v29 = vpop.permute.xlu1 %431  ;;  %v459_v49 = vadd.f32 %v458_v38, %v453_v24 }
 0x684   :  { %v434_v44 = vmul.f32 %v432_v29, %v1492_v54  ;;  %v487_v47 = vmul.f32 %v432_v29, %v1490_v53 }
 0x686   :  { %v435_v50 = vadd.f32 %v434_v44, %v429_v34  ;;  %v488_v57 = vadd.f32 %v487_v47, %v486_v48 }
 0x688   :  { %v460_v51 = vadd.f32 %v459_v49, %v435_v50  ;;  %v489_v33 = vadd.f32 %v488_v57, %v202_v58 }
 0x68a   :  { %v461_v60 = vadd.f32 %v460_v51, %v1501_v2 }
 0x68c   :  { %1297 = vtanh.f32 %v461_v60 }
 0x68d   :  { %1299 = vtanh.f32 %v489_v33 }
 0x699   :  { %v1298_v62 = vpop.eup %1297 }
 0x69a   :  { %467 = vrot.lane.b32.xlu1 %v1298_v62, %s1364_s10  ;;  %v1300_v36 = vpop.eup %1299  ;;  %v463_v63 = vmul.f32 0.5, %v1298_v62 }
 0x69b   :  { %v491_v1 = vmul.f32 0.5, %v1300_v36 }
 0x69c   :  { %v464_v0 = vadd.f32 0.5, %v463_v63 }
 0x69d   :  { %v492_v6 = vadd.f32 0.5, %v491_v1 }
 0x69e   :  { %495 = vrot.lane.b32.xlu1 %v1300_v36, %s1364_s10  ;;  %v465_v10 = vmul.f32 %v464_v0, %v1575_v59 }
 0x69f   :  { %v493_v43 = vmul.f32 %v492_v6, %v1579_v61 }
 0x70c   :  { %v468_v28 = vpop.permute.xlu1 %467 }
 0x70d   :  { %v470_v5 = vmul.f32 %v468_v28, %v464_v0 }
 0x70f   :  { %472 = vrot.lane.b32.xlu0 %v470_v5, %s1367_s11 }
 0x710   :  { %v496_v4 = vpop.permute.xlu1 %495 }
 0x711   :  { %v498_v7 = vmul.f32 %v496_v4, %v492_v6 }
 0x713   :  { %500 = vrot.lane.b32.xlu1 %v498_v7, %s1367_s11 }
 0x73d   :  { %v1648_v24 = vpop.f32.mrf.mxu1 }
 0x73f   :  { %v206_v47 = vpop.f32.mrf.mxu1 }
 0x740   :  { %v207_v58 = vadd.f32 %v206_v47, %v1442_v17 }
 0x781   :  { %v473_v11 = vpop.permute.xlu0 %472 }
 0x782   :  { %v1625_v15 = vadd.f32 %v473_v11, %v465_v10 }
 0x784   :  { %1301 = vtanh.f32 %v1625_v15 }
 0x785   :  { %v501_v14 = vpop.permute.xlu1 %500 }
 0x786   :  { %v1629_v16 = vadd.f32 %v501_v14, %v493_v43 }
 0x788   :  { %1303 = vtanh.f32 %v1629_v16 }
 0x791   :  { %v1302_v18 = vpop.eup %1301 }
 0x792   :  { %478 = vrot.lane.b32.xlu0 %v1302_v18, %s1370_s18 }
 0x795   :  { %v1304_v19 = vpop.eup %1303 }
 0x796   :  { %506 = vrot.lane.b32.xlu1 %v1304_v19, %s1370_s18 }
 0x804   :  { %v479_v21 = vpop.permute.xlu0 %478 }
 0x805   :  { %v1634_v22 = vmul.f32 %v479_v21, %v464_v0 }
 0x808   :  { %v507_v20 = vpop.permute.xlu1 %506 }
 0x809   :  { %v509_v59 = vmul.f32 %v507_v20, %v492_v6 }
 0x80b   :  { %517 = vperm.xlu1 %1240, %v509_v59   ;;  %512 = vperm.xlu0 %1239, %v509_v59  }
 0x80f   :  { %1241 = vset.pattern.permute.xlu1 %v1365_v25  ;;  %1243 = vset.pattern.permute.xlu0 %v1368_v30 }
 0x810   :  { %523 = vperm.xlu1 %1241, %v509_v59   ;;  %541 = vperm.xlu0 %1243, %v1634_v22  }
 0x814   :  { %1242 = vset.pattern.permute.xlu1 %v1366_v26  ;;  %1244 = vset.pattern.permute.xlu0 %v1369_v31 }
 0x815   :  { %529 = vperm.xlu0 %1244, %v509_v59   ;;  %536 = vperm.xlu1 %1242, %v1634_v22  }
 0x819   :  { %1245 = vset.pattern.permute.xlu1 %v1365_v25  ;;  %1248 = vset.pattern.permute.xlu0 %v1368_v30 }
 0x81a   :  { %547 = vperm.xlu1 %1245, %v1634_v22  }
 0x81e   :  { %1246 = vset.pattern.permute.xlu1 %v1369_v31 }
 0x81f   :  { %553 = vperm.xlu1 %1246, %v1634_v22  }
 0x823   :  { %1247 = vset.pattern.permute.xlu1 %v1366_v26 }
 0x886   :  { %v518_v61 = vpop.permute.xlu1 %517  ;;  %v513_v23 = vpop.permute.xlu0 %512 }
 0x887   :  { %v581_v27 = vmul.f32 %v518_v61, %v1470_v41  ;;  %v580_v29 = vmul.f32 %v513_v23, %v1464_v39  ;;  %v520_v33 = vmul.f32 %v518_v61, %v1472_v42  ;;  %v515_v62 = vmul.f32 %v513_v23, %v1466_v40 }
 0x889   :  { %v582_v48 = vadd.f32 %v581_v27, %v580_v29  ;;  %v521_v6 = vadd.f32 %v520_v33, %v515_v62 }
 0x88b   :  { %v524_v34 = vpop.permute.xlu1 %523  ;;  %v542_v38 = vpop.permute.xlu0 %541 }
 0x88c   :  { %v583_v44 = vmul.f32 %v524_v34, %v1478_v45  ;;  %v526_v1 = vmul.f32 %v524_v34, %v1482_v46  ;;  %v544_v28 = vmul.f32 %v542_v38, %v1538_v52 }
 0x88e   :  { %v584_v51 = vadd.f32 %v583_v44, %v582_v48  ;;  %v527_v9 = vadd.f32 %v526_v1, %v521_v6 }
 0x890   :  { %v537_v49 = vpop.permute.xlu1 %536  ;;  %v530_v50 = vpop.permute.xlu0 %529 }
 0x891   :  { %v585_v57 = vmul.f32 %v530_v50, %v1490_v53  ;;  %v539_v36 = vmul.f32 %v537_v49, %v1543_v55  ;;  %v532_v7 = vmul.f32 %v530_v50, %v1492_v54 }
 0x893   :  { %v586_v60 = vadd.f32 %v585_v57, %v584_v51  ;;  %v545_v4 = vadd.f32 %v544_v28, %v539_v36  ;;  %v533_v43 = vadd.f32 %v532_v7, %v527_v9 }
 0x895   :  { %v587_v63 = vadd.f32 %v586_v60, %v207_v58  ;;  %v548_v0 = vpop.permute.xlu1 %547 }
 0x896   :  { %v550_v5 = vmul.f32 %v548_v0, %v1548_v56 }
 0x897   :  { %1305 = vtanh.f32 %v587_v63 }
 0x898   :  { %v551_v10 = vadd.f32 %v550_v5, %v545_v4 }
 0x89a   :  { %v554_v8 = vpop.permute.xlu1 %553 }
 0x89b   :  { %v556_v11 = vmul.f32 %v554_v8, %v1559_v32 }
 0x89d   :  { %v557_v14 = vadd.f32 %v556_v11, %v551_v10 }
 0x89f   :  { %v558_v18 = vadd.f32 %v557_v14, %v533_v43 }
 0x8a1   :  { %v559_v19 = vadd.f32 %v558_v18, %v1501_v2 }
 0x8a3   :  { %1307 = vtanh.f32 %v559_v19 }
 0x8a4   :  { %v1306_v20 = vpop.eup %1305 }
 0x8a5   :  { %593 = vrot.lane.b32.xlu0 %v1306_v20, %s1364_s10  ;;  %v589_v21 = vmul.f32 0.5, %v1306_v20 }
 0x8a7   :  { %v590_v61 = vadd.f32 0.5, %v589_v21 }
 0x8a9   :  { %v591_v47 = vmul.f32 %v590_v61, %v1629_v16 }
 0x8b0   :  { %v1308_v59 = vpop.eup %1307 }
 0x8b1   :  { %565 = vrot.lane.b32.xlu1 %v1308_v59, %s1364_s10  ;;  %v561_v29 = vmul.f32 0.5, %v1308_v59 }
 0x8b3   :  { %v562_v34 = vadd.f32 0.5, %v561_v29 }
 0x8b5   :  { %v563_v50 = vmul.f32 %v562_v34, %v1625_v15 }
 0x917   :  { %v594_v23 = vpop.permute.xlu0 %593 }
 0x918   :  { %v596_v27 = vmul.f32 %v594_v23, %v590_v61 }
 0x91a   :  { %598 = vrot.lane.b32.xlu0 %v596_v27, %s1367_s11 }
 0x923   :  { %v566_v38 = vpop.permute.xlu1 %565 }
 0x924   :  { %v568_v44 = vmul.f32 %v566_v38, %v562_v34 }
 0x926   :  { %570 = vrot.lane.b32.xlu1 %v568_v44, %s1367_s11 }
 0x98c   :  { %v599_v48 = vpop.permute.xlu0 %598 }
 0x98d   :  { %v1669_v49 = vadd.f32 %v599_v48, %v591_v47 }
 0x98f   :  { %1309 = vtanh.f32 %v1669_v49 }
 0x998   :  { %v571_v51 = vpop.permute.xlu1 %570 }
 0x999   :  { %v1673_v57 = vadd.f32 %v571_v51, %v563_v50  ;;  %v212_v51 = vadd.f32 %v1648_v24, %v1442_v17 }
 0x99b   :  { %1311 = vtanh.f32 %v1673_v57 }
 0x99c   :  { %v1310_v58 = vpop.eup %1309 }
 0x99d   :  { %604 = vrot.lane.b32.xlu0 %v1310_v58, %s1370_s18 }
 0x9a8   :  { %v1312_v60 = vpop.eup %1311 }
 0x9a9   :  { %576 = vrot.lane.b32.xlu1 %v1312_v60, %s1370_s18 }
 0xa0f   :  { %v605_v33 = vpop.permute.xlu0 %604 }
 0xa10   :  { %v607_v16 = vmul.f32 %v605_v33, %v590_v61 }
 0xa12   :  { %615 = vperm.xlu0 %1248, %v607_v16   ;;  %610 = vperm.xlu1 %1247, %v607_v16  }
 0xa16   :  { %1249 = vset.pattern.permute.xlu0 %v1365_v25 }
 0xa17   :  { %621 = vperm.xlu0 %1249, %v607_v16  }
 0xa1b   :  { %v577_v62 = vpop.permute.xlu1 %576  ;;  %1253 = vset.pattern.permute.xlu0 %v1369_v31 }
 0xa1c   :  { %v1680_v15 = vmul.f32 %v577_v62, %v562_v34 }
 0xa1e   :  { %651 = vperm.xlu0 %1253, %v1680_v15   ;;  %634 = vperm.xlu1 %1247, %v1680_v15  }
 0xa22   :  { %1250 = vset.pattern.permute.xlu1 %v1368_v30  ;;  %1254 = vset.pattern.permute.xlu0 %v1366_v26 }
 0xa23   :  { %639 = vperm.xlu1 %1250, %v1680_v15  }
 0xa27   :  { %1251 = vset.pattern.permute.xlu1 %v1365_v25 }
 0xa28   :  { %645 = vperm.xlu1 %1251, %v1680_v15  }
 0xa2c   :  { %1252 = vset.pattern.permute.xlu1 %v1369_v31 }
 0xa2d   :  { %627 = vperm.xlu1 %1252, %v607_v16  }
 0xa31   :  { %1255 = vset.pattern.permute.xlu1 %v1368_v30 }
 0xa8d   :  { %v611_v36 = vpop.permute.xlu1 %610  ;;  %v616_v0 = vpop.permute.xlu0 %615 }
 0xa8e   :  { %v618_v6 = vmul.f32 %v616_v0, %v1472_v42  ;;  %v613_v4 = vmul.f32 %v611_v36, %v1466_v40  ;;  %v679_v9 = vmul.f32 %v616_v0, %v1470_v41  ;;  %v678_v10 = vmul.f32 %v611_v36, %v1464_v39 }
 0xa90   :  { %v619_v19 = vadd.f32 %v618_v6, %v613_v4  ;;  %v680_v21 = vadd.f32 %v679_v9, %v678_v10  ;;  %v75_v6 = vld [vmem:[%s1863_s0 + $0x30] sm:$0xff]  ;;  %v76_v4 = vld [vmem:[%s1863_s0 + $0x38] sm:$0xff] }
 0xa91   :  { %1187 = vmatprep.mubr.msk.f32.mxu1 %vm91_vm1, %v75_v6 }
 0xa92   :  { %v622_v5 = vpop.permute.xlu0 %621  ;;  %1188 = vmatmul.mubr.msk.f32.gmra.mxu1 %vm91_vm1, %v76_v4 }
 0xa93   :  { %v624_v43 = vmul.f32 %v622_v5, %v1482_v46  ;;  %v681_v20 = vmul.f32 %v622_v5, %v1478_v45 }
 0xa95   :  { %v625_v23 = vadd.f32 %v624_v43, %v619_v19  ;;  %v682_v38 = vadd.f32 %v681_v20, %v680_v21 }
 0xa99   :  { %v635_v63 = vpop.permute.xlu1 %634  ;;  %v652_v18 = vpop.permute.xlu0 %651 }
 0xa9a   :  { %v637_v7 = vmul.f32 %v635_v63, %v1543_v55  ;;  %v654_v27 = vmul.f32 %v652_v18, %v1559_v32 }
 0xa9e   :  { %v640_v1 = vpop.permute.xlu1 %639 }
 0xa9f   :  { %v642_v28 = vmul.f32 %v640_v1, %v1538_v52 }
 0xaa1   :  { %v643_v14 = vadd.f32 %v642_v28, %v637_v7 }
 0xaa3   :  { %v646_v8 = vpop.permute.xlu1 %645 }
 0xaa4   :  { %v648_v11 = vmul.f32 %v646_v8, %v1548_v56 }
 0xaa6   :  { %v649_v59 = vadd.f32 %v648_v11, %v643_v14 }
 0xaa8   :  { %v628_v61 = vpop.permute.xlu1 %627  ;;  %v655_v44 = vadd.f32 %v654_v27, %v649_v59 }
 0xaa9   :  { %v630_v29 = vmul.f32 %v628_v61, %v1492_v54  ;;  %v683_v34 = vmul.f32 %v628_v61, %v1490_v53 }
 0xaab   :  { %v631_v47 = vadd.f32 %v630_v29, %v625_v23  ;;  %v684_v50 = vadd.f32 %v683_v34, %v682_v38 }
 0xaad   :  { %v656_v48 = vadd.f32 %v655_v44, %v631_v47  ;;  %v685_v60 = vadd.f32 %v684_v50, %v212_v51 }
 0xaaf   :  { %v657_v58 = vadd.f32 %v656_v48, %v1501_v2 }
 0xab1   :  { %1313 = vtanh.f32 %v657_v58 }
 0xab2   :  { %1315 = vtanh.f32 %v685_v60 }
 0xabe   :  { %v1314_v33 = vpop.eup %1313 }
 0xabf   :  { %663 = vrot.lane.b32.xlu1 %v1314_v33, %s1364_s10  ;;  %v1316_v16 = vpop.eup %1315  ;;  %v659_v62 = vmul.f32 0.5, %v1314_v33 }
 0xac0   :  { %v687_v63 = vmul.f32 0.5, %v1316_v16 }
 0xac1   :  { %v660_v36 = vadd.f32 0.5, %v659_v62 }
 0xac2   :  { %v688_v28 = vadd.f32 0.5, %v687_v63 }
 0xac3   :  { %691 = vrot.lane.b32.xlu1 %v1316_v16, %s1364_s10  ;;  %v661_v7 = vmul.f32 %v660_v36, %v1673_v57 }
 0xac4   :  { %v689_v10 = vmul.f32 %v688_v28, %v1669_v49 }
 0xb31   :  { %v664_v0 = vpop.permute.xlu1 %663 }
 0xb32   :  { %v666_v1 = vmul.f32 %v664_v0, %v660_v36 }
 0xb34   :  { %668 = vrot.lane.b32.xlu0 %v666_v1, %s1367_s11 }
 0xb35   :  { %v692_v24 = vpop.permute.xlu1 %691 }
 0xb36   :  { %v694_v5 = vmul.f32 %v692_v24, %v688_v28 }
 0xb38   :  { %696 = vrot.lane.b32.xlu1 %v694_v5, %s1367_s11 }
 0xb52   :  { %v1742_v61 = vpop.f32.mrf.mxu1 }
 0xb54   :  { %v216_v44 = vpop.f32.mrf.mxu1 }
 0xb55   :  { %v217_v60 = vadd.f32 %v216_v44, %v1442_v17 }
 0xba6   :  { %v669_v8 = vpop.permute.xlu0 %668 }
 0xba7   :  { %v1719_v9 = vadd.f32 %v669_v8, %v661_v7 }
 0xba9   :  { %1317 = vtanh.f32 %v1719_v9 }
 0xbaa   :  { %v697_v11 = vpop.permute.xlu1 %696 }
 0xbab   :  { %v1723_v43 = vadd.f32 %v697_v11, %v689_v10 }
 0xbad   :  { %1319 = vtanh.f32 %v1723_v43 }
 0xbb6   :  { %v1318_v14 = vpop.eup %1317 }
 0xbb7   :  { %674 = vrot.lane.b32.xlu0 %v1318_v14, %s1370_s18 }
 0xbba   :  { %v1320_v18 = vpop.eup %1319 }
 0xbbb   :  { %702 = vrot.lane.b32.xlu1 %v1320_v18, %s1370_s18 }
 0xc29   :  { %v675_v20 = vpop.permute.xlu0 %674 }
 0xc2a   :  { %v1728_v59 = vmul.f32 %v675_v20, %v660_v36 }
 0xc2d   :  { %v703_v19 = vpop.permute.xlu1 %702 }
 0xc2e   :  { %v705_v57 = vmul.f32 %v703_v19, %v688_v28 }
 0xc30   :  { %713 = vperm.xlu1 %1255, %v705_v57   ;;  %708 = vperm.xlu0 %1254, %v705_v57  }
 0xc34   :  { %1256 = vset.pattern.permute.xlu1 %v1365_v25  ;;  %1258 = vset.pattern.permute.xlu0 %v1368_v30 }
 0xc35   :  { %719 = vperm.xlu1 %1256, %v705_v57   ;;  %737 = vperm.xlu0 %1258, %v1728_v59  }
 0xc39   :  { %1257 = vset.pattern.permute.xlu1 %v1366_v26  ;;  %1259 = vset.pattern.permute.xlu0 %v1369_v31 }
 0xc3a   :  { %725 = vperm.xlu0 %1259, %v705_v57   ;;  %732 = vperm.xlu1 %1257, %v1728_v59  }
 0xc3e   :  { %1260 = vset.pattern.permute.xlu1 %v1365_v25  ;;  %1263 = vset.pattern.permute.xlu0 %v1368_v30 }
 0xc3f   :  { %743 = vperm.xlu1 %1260, %v1728_v59  }
 0xc43   :  { %1261 = vset.pattern.permute.xlu1 %v1369_v31 }
 0xc44   :  { %749 = vperm.xlu1 %1261, %v1728_v59  }
 0xc48   :  { %1262 = vset.pattern.permute.xlu1 %v1366_v26 }
 0xcab   :  { %v714_v49 = vpop.permute.xlu1 %713  ;;  %v709_v21 = vpop.permute.xlu0 %708 }
 0xcac   :  { %v777_v23 = vmul.f32 %v714_v49, %v1470_v41  ;;  %v776_v27 = vmul.f32 %v709_v21, %v1464_v39  ;;  %v716_v16 = vmul.f32 %v714_v49, %v1472_v42  ;;  %v711_v62 = vmul.f32 %v709_v21, %v1466_v40 }
 0xcae   :  { %v778_v47 = vadd.f32 %v777_v23, %v776_v27  ;;  %v717_v5 = vadd.f32 %v716_v16, %v711_v62 }
 0xcb0   :  { %v720_v29 = vpop.permute.xlu1 %719  ;;  %v738_v34 = vpop.permute.xlu0 %737 }
 0xcb1   :  { %v779_v38 = vmul.f32 %v720_v29, %v1478_v45  ;;  %v722_v1 = vmul.f32 %v720_v29, %v1482_v46  ;;  %v740_v28 = vmul.f32 %v738_v34, %v1538_v52 }
 0xcb3   :  { %v780_v51 = vadd.f32 %v779_v38, %v778_v47  ;;  %v723_v8 = vadd.f32 %v722_v1, %v717_v5 }
 0xcb5   :  { %v733_v48 = vpop.permute.xlu1 %732  ;;  %v726_v50 = vpop.permute.xlu0 %725 }
 0xcb6   :  { %v781_v58 = vmul.f32 %v726_v50, %v1490_v53  ;;  %v735_v36 = vmul.f32 %v733_v48, %v1543_v55  ;;  %v728_v4 = vmul.f32 %v726_v50, %v1492_v54 }
 0xcb8   :  { %v782_v33 = vadd.f32 %v781_v58, %v780_v51  ;;  %v741_v6 = vadd.f32 %v740_v28, %v735_v36  ;;  %v729_v14 = vadd.f32 %v728_v4, %v723_v8 }
 0xcba   :  { %v783_v63 = vadd.f32 %v782_v33, %v217_v60  ;;  %v744_v0 = vpop.permute.xlu1 %743 }
 0xcbb   :  { %v746_v24 = vmul.f32 %v744_v0, %v1548_v56 }
 0xcbc   :  { %1321 = vtanh.f32 %v783_v63 }
 0xcbd   :  { %v747_v10 = vadd.f32 %v746_v24, %v741_v6 }
 0xcbf   :  { %v750_v7 = vpop.permute.xlu1 %749 }
 0xcc0   :  { %v752_v11 = vmul.f32 %v750_v7, %v1559_v32 }
 0xcc2   :  { %v753_v18 = vadd.f32 %v752_v11, %v747_v10 }
 0xcc4   :  { %v754_v19 = vadd.f32 %v753_v18, %v729_v14 }
 0xcc6   :  { %v755_v57 = vadd.f32 %v754_v19, %v1501_v2 }
 0xcc8   :  { %1323 = vtanh.f32 %v755_v57 }
 0xcc9   :  { %v1322_v20 = vpop.eup %1321 }
 0xcca   :  { %789 = vrot.lane.b32.xlu0 %v1322_v20, %s1364_s10  ;;  %v785_v21 = vmul.f32 0.5, %v1322_v20 }
 0xccc   :  { %v786_v23 = vadd.f32 0.5, %v785_v21 }
 0xcce   :  { %v787_v48 = vmul.f32 %v786_v23, %v1723_v43 }
 0xcd5   :  { %v1324_v49 = vpop.eup %1323 }
 0xcd6   :  { %761 = vrot.lane.b32.xlu1 %v1324_v49, %s1364_s10  ;;  %v757_v34 = vmul.f32 0.5, %v1324_v49 }
 0xcd8   :  { %v758_v38 = vadd.f32 0.5, %v757_v34 }
 0xcda   :  { %v759_v58 = vmul.f32 %v758_v38, %v1719_v9 }
 0xd3c   :  { %v790_v27 = vpop.permute.xlu0 %789 }
 0xd3d   :  { %v792_v29 = vmul.f32 %v790_v27, %v786_v23 }
 0xd3f   :  { %794 = vrot.lane.b32.xlu0 %v792_v29, %s1367_s11 }
 0xd48   :  { %v762_v44 = vpop.permute.xlu1 %761 }
 0xd49   :  { %v764_v47 = vmul.f32 %v762_v44, %v758_v38 }
 0xd4b   :  { %766 = vrot.lane.b32.xlu1 %v764_v47, %s1367_s11 }
 0xdb1   :  { %v795_v50 = vpop.permute.xlu0 %794 }
 0xdb2   :  { %v1763_v51 = vadd.f32 %v795_v50, %v787_v48 }
 0xdb4   :  { %1325 = vtanh.f32 %v1763_v51 }
 0xdbd   :  { %v767_v60 = vpop.permute.xlu1 %766 }
 0xdbe   :  { %v1767_v33 = vadd.f32 %v767_v60, %v759_v58  ;;  %v222_v60 = vadd.f32 %v1742_v61, %v1442_v17 }
 0xdc0   :  { %1327 = vtanh.f32 %v1767_v33 }
 0xdc1   :  { %v1326_v16 = vpop.eup %1325 }
 0xdc2   :  { %800 = vrot.lane.b32.xlu0 %v1326_v16, %s1370_s18 }
 0xdcd   :  { %v1328_v62 = vpop.eup %1327 }
 0xdce   :  { %772 = vrot.lane.b32.xlu1 %v1328_v62, %s1370_s18 }
 0xe34   :  { %v801_v36 = vpop.permute.xlu0 %800 }
 0xe35   :  { %v803_v43 = vmul.f32 %v801_v36, %v786_v23 }
 0xe37   :  { %811 = vperm.xlu0 %1263, %v803_v43   ;;  %806 = vperm.xlu1 %1262, %v803_v43  }
 0xe3b   :  { %1264 = vset.pattern.permute.xlu0 %v1365_v25 }
 0xe3c   :  { %817 = vperm.xlu0 %1264, %v803_v43  }
 0xe40   :  { %v773_v63 = vpop.permute.xlu1 %772  ;;  %1268 = vset.pattern.permute.xlu0 %v1369_v31 }
 0xe41   :  { %v1774_v9 = vmul.f32 %v773_v63, %v758_v38 }
 0xe43   :  { %847 = vperm.xlu0 %1268, %v1774_v9   ;;  %830 = vperm.xlu1 %1262, %v1774_v9  }
 0xe47   :  { %1265 = vset.pattern.permute.xlu1 %v1368_v30  ;;  %1269 = vset.pattern.permute.xlu0 %v1366_v26 }
 0xe48   :  { %835 = vperm.xlu1 %1265, %v1774_v9  }
 0xe4c   :  { %1266 = vset.pattern.permute.xlu1 %v1365_v25 }
 0xe4d   :  { %841 = vperm.xlu1 %1266, %v1774_v9  }
 0xe51   :  { %1267 = vset.pattern.permute.xlu1 %v1369_v31 }
 0xe52   :  { %823 = vperm.xlu1 %1267, %v803_v43  }
 0xe56   :  { %1270 = vset.pattern.permute.xlu1 %v1368_v30 }
 0xeb2   :  { %v807_v0 = vpop.permute.xlu1 %806  ;;  %v812_v28 = vpop.permute.xlu0 %811 }
 0xeb3   :  { %v814_v4 = vmul.f32 %v812_v28, %v1472_v42  ;;  %v809_v7 = vmul.f32 %v807_v0, %v1466_v40  ;;  %v875_v11 = vmul.f32 %v812_v28, %v1470_v41  ;;  %v874_v14 = vmul.f32 %v807_v0, %v1464_v39 }
 0xeb5   :  { %v815_v49 = vadd.f32 %v814_v4, %v809_v7  ;;  %v876_v27 = vadd.f32 %v875_v11, %v874_v14 }
 0xeb7   :  { %v818_v6 = vpop.permute.xlu0 %817 }
 0xeb8   :  { %v820_v19 = vmul.f32 %v818_v6, %v1482_v46  ;;  %v877_v21 = vmul.f32 %v818_v6, %v1478_v45 }
 0xeba   :  { %v821_v34 = vadd.f32 %v820_v19, %v815_v49  ;;  %v878_v39 = vadd.f32 %v877_v21, %v876_v27 }
 0xebe   :  { %v831_v1 = vpop.permute.xlu1 %830  ;;  %v848_v20 = vpop.permute.xlu0 %847 }
 0xebf   :  { %v833_v8 = vmul.f32 %v831_v1, %v1543_v55  ;;  %v850_v38 = vmul.f32 %v848_v20, %v1559_v32 }
 0xec3   :  { %v836_v24 = vpop.permute.xlu1 %835 }
 0xec4   :  { %v838_v5 = vmul.f32 %v836_v24, %v1538_v52 }
 0xec6   :  { %v839_v57 = vadd.f32 %v838_v5, %v833_v8 }
 0xec8   :  { %v842_v10 = vpop.permute.xlu1 %841 }
 0xec9   :  { %v844_v18 = vmul.f32 %v842_v10, %v1548_v56 }
 0xecb   :  { %v845_v23 = vadd.f32 %v844_v18, %v839_v57 }
 0xecd   :  { %v824_v29 = vpop.permute.xlu1 %823  ;;  %v851_v47 = vadd.f32 %v850_v38, %v845_v23 }
 0xece   :  { %v826_v44 = vmul.f32 %v824_v29, %v1492_v54  ;;  %v879_v41 = vmul.f32 %v824_v29, %v1490_v53 }
 0xed0   :  { %v827_v48 = vadd.f32 %v826_v44, %v821_v34  ;;  %v880_v58 = vadd.f32 %v879_v41, %v878_v39 }
 0xed2   :  { %v852_v50 = vadd.f32 %v851_v47, %v827_v48  ;;  %v881_v16 = vadd.f32 %v880_v58, %v222_v60 }
 0xed4   :  { %v853_v45 = vadd.f32 %v852_v50, %v1501_v2 }
 0xed6   :  { %1329 = vtanh.f32 %v853_v45 }
 0xed7   :  { %1331 = vtanh.f32 %v881_v16 }
 0xee3   :  { %v1330_v62 = vpop.eup %1329 }
 0xee4   :  { %859 = vrot.lane.b32.xlu1 %v1330_v62, %s1364_s10  ;;  %v1332_v36 = vpop.eup %1331  ;;  %v855_v53 = vmul.f32 0.5, %v1330_v62 }
 0xee5   :  { %v883_v63 = vmul.f32 0.5, %v1332_v36 }
 0xee6   :  { %v856_v43 = vadd.f32 0.5, %v855_v53 }
 0xee7   :  { %v884_v28 = vadd.f32 0.5, %v883_v63 }
 0xee8   :  { %887 = vrot.lane.b32.xlu1 %v1332_v36, %s1364_s10  ;;  %v857_v24 = vmul.f32 %v856_v43, %v1767_v33 }
 0xee9   :  { %v885_v4 = vmul.f32 %v884_v28, %v1763_v51 }
 0xf56   :  { %v860_v0 = vpop.permute.xlu1 %859 }
 0xf57   :  { %v862_v1 = vmul.f32 %v860_v0, %v856_v43 }
 0xf59   :  { %864 = vrot.lane.b32.xlu0 %v862_v1, %s1367_s11 }
 0xf5a   :  { %v888_v17 = vpop.permute.xlu1 %887 }
 0xf5b   :  { %v890_v61 = vmul.f32 %v888_v17, %v884_v28 }
 0xf5d   :  { %892 = vrot.lane.b32.xlu1 %v890_v61, %s1367_s11 }
 0xfcb   :  { %v865_v5 = vpop.permute.xlu0 %864 }
 0xfcc   :  { %v1805_v6 = vadd.f32 %v865_v5, %v857_v24 }
 0xfce   :  { %1333 = vtanh.f32 %v1805_v6 }
 0xfcf   :  { %v893_v7 = vpop.permute.xlu1 %892 }
 0xfd0   :  { %v895_v8 = vadd.f32 %v893_v7, %v885_v4 }
 0xfd2   :  { %1335 = vtanh.f32 %v895_v8 }
 0xfdb   :  { %v1334_v10 = vpop.eup %1333 }
 0xfdc   :  { %870 = vrot.lane.b32.xlu0 %v1334_v10, %s1370_s18 }
 0xfdf   :  { %v1336_v11 = vpop.eup %1335 }
 0xfe0   :  { %898 = vrot.lane.b32.xlu1 %v1336_v11, %s1370_s18 }
0x104e   :  { %v871_v19 = vpop.permute.xlu0 %870 }
0x104f   :  { %v873_v33 = vmul.f32 %v871_v19, %v856_v43 }
0x1052   :  { %v899_v14 = vpop.permute.xlu1 %898 }
0x1053   :  { %v901_v18 = vmul.f32 %v899_v14, %v884_v28 }
0x1055   :  { %909 = vperm.xlu1 %1270, %v901_v18   ;;  %904 = vperm.xlu0 %1269, %v901_v18  }
0x1059   :  { %1271 = vset.pattern.permute.xlu1 %v1365_v25  ;;  %1273 = vset.pattern.permute.xlu0 %v1368_v30 }
0x105a   :  { %915 = vperm.xlu1 %1271, %v901_v18   ;;  %933 = vperm.xlu0 %1273, %v873_v33  }
0x105e   :  { %1272 = vset.pattern.permute.xlu1 %v1366_v26  ;;  %1274 = vset.pattern.permute.xlu0 %v1369_v31 }
0x105f   :  { %921 = vperm.xlu0 %1274, %v901_v18   ;;  %928 = vperm.xlu1 %1272, %v873_v33  }
0x1063   :  { %1275 = vset.pattern.permute.xlu1 %v1365_v25 }
0x1064   :  { %939 = vperm.xlu1 %1275, %v873_v33  }
0x1068   :  { %1276 = vset.pattern.permute.xlu1 %v1369_v31 }
0x1069   :  { %945 = vperm.xlu1 %1276, %v873_v33  }
0x10d0   :  { %v910_v51 = vpop.permute.xlu1 %909  ;;  %v905_v57 = vpop.permute.xlu0 %904 }
0x10d1   :  { %v912_v30 = vmul.f32 %v910_v51, %v1472_v42  ;;  %v907_v23 = vmul.f32 %v905_v57, %v1466_v40 }
0x10d3   :  { %v913_v38 = vadd.f32 %v912_v30, %v907_v23 }
0x10d5   :  { %v916_v20 = vpop.permute.xlu1 %915  ;;  %v934_v49 = vpop.permute.xlu0 %933 }
0x10d6   :  { %v918_v34 = vmul.f32 %v916_v20, %v1482_v46  ;;  %v936_v25 = vmul.f32 %v934_v49, %v1538_v52  ;;  %v1341_v52 = vld [vmem:[%s1865_s2 + $0x8] sm:$0xff] }
0x10d7   :  { %v1046_v53 = vrot.slane %v1341_v52, 7 }
0x10d8   :  { %v919_v47 = vadd.f32 %v918_v34, %v913_v38 }
0x10d9   :  { %1210 = vpush %v1046_v53 }
0x10da   :  { %v929_v21 = vpop.permute.xlu1 %928  ;;  %v922_v29 = vpop.permute.xlu0 %921 }
0x10db   :  { %v931_v26 = vmul.f32 %v929_v21, %v1543_v55  ;;  %v924_v41 = vmul.f32 %v922_v29, %v1492_v54  ;;  %v975_v54 = vrot.slane %v1341_v52, %v43_v37  ;;  %v1067_v21 = vand.u32 127, %v17_v12 }
0x10dd   :  { %v937_v44 = vadd.f32 %v936_v25, %v931_v26  ;;  %v925_v40 = vadd.f32 %v924_v41, %v919_v47  ;;  %v1070_v34 = vsub.s32 %v1067_v21, %v1431_v13 }
0x10df   :  { %v940_v27 = vpop.permute.xlu1 %939 }
0x10e0   :  { %v942_v31 = vmul.f32 %v940_v27, %v1548_v56 }
0x10e2   :  { %v943_v48 = vadd.f32 %v942_v31, %v937_v44 }
0x10e4   :  { %v946_v39 = vpop.permute.xlu1 %945 }
0x10e5   :  { %v948_v42 = vmul.f32 %v946_v39, %v1559_v32 }
0x10e7   :  { %v949_v50 = vadd.f32 %v948_v42, %v943_v48 }
0x10e9   :  { %v950_v55 = vadd.f32 %v949_v50, %v925_v40 }
0x10eb   :  { %v951_v58 = vadd.f32 %v950_v55, %v1501_v2 }
0x10ed   :  { %1337 = vtanh.f32 %v951_v58 }
0x10fa   :  { %v1338_v46 = vpop.eup %1337 }
0x10fb   :  { %957 = vrot.lane.b32.xlu1 %v1338_v46, %s1364_s10  ;;  %v953_v56 = vmul.f32 0.5, %v1338_v46 }
0x10fd   :  { %v954_v32 = vadd.f32 0.5, %v953_v56 }
0x10ff   :  { %977 = vrot.lane.b32.xlu1 %v975_v54, %s1370_s18  ;;  %v955_v43 = vmul.f32 %v954_v32, %v1805_v6 }
0x110a   :  { %s1211_s2 = spop %1210 }
0x110b   :  { %v1048_v30 = vstv %s1211_s2 }
0x116d   :  { %v958_v60 = vpop.permute.xlu1 %957 }
0x116e   :  { %v960_v45 = vmul.f32 %v958_v60, %v954_v32 }
0x1170   :  { %962 = vrot.lane.b32.xlu0 %v960_v45, %s1367_s11 }
0x1171   :  { %v978_v2 = vpop.permute.xlu1 %977 }
0x1172   :  { %v980_v16 = vmul.f32 %v978_v2, %v1520_v35  ;;  %v982_v62 = vmul.f32 %v978_v2, %v1634_v22  ;;  %v984_v36 = vmul.f32 %v978_v2, %v1728_v59  ;;  %v986_v37 = vmul.f32 %v978_v2, %v873_v33 }
0x1173   :  { %v981_v59 = vmul.f32 %v978_v2, %v1584_v3  ;;  %v983_v28 = vmul.f32 %v978_v2, %v1680_v15  ;;  %v985_v17 = vmul.f32 %v978_v2, %v1774_v9 }
0x1174   :  { %996 = vrot.lane.b32.xlu1 %v980_v16, %s1364_s10 }
0x1178   :  { %1000 = vrot.lane.b32.xlu1 %v982_v62, %s1364_s10 }
0x117c   :  { %1004 = vrot.lane.b32.xlu1 %v984_v36, %s1364_s10 }
0x1180   :  { %1008 = vrot.lane.b32.xlu1 %v986_v37, %s1364_s10 }
0x11e2   :  { %v963_v63 = vpop.permute.xlu0 %962 }
0x11e3   :  { %v965_v0 = vadd.f32 %v963_v63, %v955_v43 }
0x11e5   :  { %1339 = vtanh.f32 %v965_v0 }
0x11e6   :  { %v997_v35 = vpop.permute.xlu1 %996 }
0x11e7   :  { %v1021_v22 = vsel %vm1020_vm2, %v997_v35, 0.0 }
0x11e8   :  { %1022 = vadd.xlane.f32.xlu1 %v1021_v22 }
0x11ea   :  { %v1001_v15 = vpop.permute.xlu1 %1000 }
0x11eb   :  { %v1027_v11 = vsel %vm1020_vm2, %v1001_v15, 0.0 }
0x11ee   :  { %v1005_v9 = vpop.permute.xlu1 %1004 }
0x11ef   :  { %v1033_v14 = vsel %vm1020_vm2, %v1005_v9, 0.0 }
0x11f2   :  { %v1340_v1 = vpop.eup %1339  ;;  %v1009_v18 = vpop.permute.xlu1 %1008 }
0x11f3   :  { %968 = vrot.lane.b32.xlu0 %v1340_v1, %s1370_s18  ;;  %v1039_v19 = vsel %vm1020_vm2, %v1009_v18, 0.0 }
0x11f7   :  { %998 = vrot.lane.b32.xlu0 %v981_v59, %s1364_s10 }
0x11fb   :  { %1002 = vrot.lane.b32.xlu0 %v983_v28, %s1364_s10 }
0x11ff   :  { %1006 = vrot.lane.b32.xlu0 %v985_v17, %s1364_s10 }
0x1265   :  { %v969_v61 = vpop.permute.xlu0 %968 }
0x1266   :  { %v971_v24 = vmul.f32 %v969_v61, %v954_v32 }
0x1268   :  { %v987_v5 = vmul.f32 %v978_v2, %v971_v24 }
0x1269   :  { %v999_v6 = vpop.permute.xlu0 %998 }
0x126a   :  { %1010 = vrot.lane.b32.xlu0 %v987_v5, %s1364_s10  ;;  %v1024_v10 = vsel %vm1020_vm2, %v999_v6, 0.0 }
0x126d   :  { %v1003_v4 = vpop.permute.xlu0 %1002 }
0x126e   :  { %v1030_v7 = vsel %vm1020_vm2, %v1003_v4, 0.0 }
0x126f   :  { %1031 = vadd.xlane.f32.xlu1 %v1030_v7 }
0x1271   :  { %v1007_v3 = vpop.permute.xlu0 %1006  ;;  %v1023_v49 = vpop.xlane.xlu1 %1022 }
0x1272   :  { %v1036_v8 = vsel %vm1020_vm2, %v1007_v3, 0.0  ;;  %v1050_v25 = vadd.f32 %v1048_v30, %v1023_v49 }
0x1273   :  { %1037 = vadd.xlane.f32.xlu1 %v1036_v8 }
0x1274   :  { %v1071_v41 = vrot.slane %v1050_v25, %v1070_v34 }
0x1289   :  { %1025 = vadd.xlane.f32.xlu0 %v1024_v10 }
0x128d   :  { %1028 = vadd.xlane.f32.xlu0 %v1027_v11 }
0x1291   :  { %1034 = vadd.xlane.f32.xlu0 %v1033_v14 }
0x1295   :  { %1040 = vadd.xlane.f32.xlu0 %v1039_v19 }
0x12dc   :  { %v1011_v33 = vpop.permute.xlu0 %1010 }
0x12dd   :  { %v1042_v51 = vsel %vm1020_vm2, %v1011_v33, 0.0 }
0x12de   :  { %1043 = vadd.xlane.f32.xlu1 %v1042_v51 }
0x12f8   :  { %v1032_v27 = vpop.xlane.xlu1 %1031 }
0x12f9   :  { %v1053_v39 = vadd.f32 %v1048_v30, %v1032_v27 }
0x12fb   :  { %v1083_v55 = vrot.slane %v1053_v39, %v1070_v34 }
0x12fc   :  { %v1038_v48 = vpop.xlane.xlu1 %1037 }
0x12fd   :  { %v1055_v58 = vadd.f32 %v1048_v30, %v1038_v48 }
0x12ff   :  { %v1091_v56 = vrot.slane %v1055_v58, %v1070_v34 }
0x1312   :  { %v1026_v57 = vpop.xlane.xlu0 %1025 }
0x1313   :  { %v1051_v23 = vadd.f32 %v1048_v30, %v1026_v57 }
0x1315   :  { %v1075_v31 = vrot.slane %v1051_v23, %v1070_v34 }
0x1316   :  { %v1029_v20 = vpop.xlane.xlu0 %1028 }
0x1317   :  { %v1052_v29 = vadd.f32 %v1048_v30, %v1029_v20  ;;  %v1101_v42 = vsel %vm1100_vm3, %v1075_v31, %v1071_v41 }
0x1319   :  { %v1079_v38 = vrot.slane %v1052_v29, %v1070_v34 }
0x131a   :  { %v1035_v26 = vpop.xlane.xlu0 %1034 }
0x131b   :  { %v1054_v44 = vadd.f32 %v1048_v30, %v1035_v26  ;;  %v1103_v40 = vsel %vm1102_vm4, %v1079_v38, %v1101_v42 }
0x131c   :  { %v1105_v46 = vsel %vm1104_vm5, %v1083_v55, %v1103_v40 }
0x131d   :  { %v1087_v12 = vrot.slane %v1054_v44, %v1070_v34 }
0x131e   :  { %v1041_v47 = vpop.xlane.xlu0 %1040 }
0x131f   :  { %v1056_v50 = vadd.f32 %v1048_v30, %v1041_v47  ;;  %v1107_v13 = vsel %vm1106_vm6, %v1087_v12, %v1105_v46 }
0x1320   :  { %v1109_v45 = vsel %vm1108_vm7, %v1091_v56, %v1107_v13 }
0x1321   :  { %v1095_v52 = vrot.slane %v1056_v50, %v1070_v34 }
0x1323   :  { %v1111_v2 = vsel %vm1110_vm8, %v1095_v52, %v1109_v45 }
0x1367   :  { %v1044_v54 = vpop.xlane.xlu1 %1043 }
0x1368   :  { %v1057_v32 = vadd.f32 %v1048_v30, %v1044_v54 }
0x136a   :  { %v1099_v60 = vrot.slane %v1057_v32, %v1070_v34 }
0x136c   :  { %v1113_v16 = vsel %vm1112_vm9, %v1099_v60, %v1111_v2 }
0x136d   :  { %1116 = vst.msk [vmem:[#allocation2] sm:$0xff] %vm1115_vm10, %v1113_v16 }
0x136e   :  { %1353 = shalt.err (!%p1350_p4)
}
0x136f   :  { %1126 = dma.vmem_to_hbm [thread:$0]  %s1124_s29, 128, %s1866_s3, [#allocation3]  }
0x1370   :  { %1362 = dma.done.wait [#allocation3], 128  }
0x1371   :  { %1363 = vsyncadd [#allocation3], 4294967168 }
0x1372   :  { %1130 = vsyncpa [#allocation3], 1 }

</bundles_post_ra>
